<compile_context>
chip_gen: v5e
topology: v5e:2x2
jax: 0.10.0
libtpu: 0.0.40
codegen_flags: <defaults>
</compile_context>

<pallas_src>
import functools

import jax
import jax.numpy as jnp
from jax.experimental import pallas as pl
from jax.experimental.pallas import tpu as pltpu


def _encoder_gru_kernel(x_ref,      # (T, H)   f32  embedded inputs (gathered rows)
                        h0_ref,     # (1, H)   f32  initial hidden
                        wih_ref,    # (H, 3H)  bf16 W_ih^T  (columns r|z|n)
                        bih_ref,    # (1, 3H)  f32  b_ih
                        whh_ref,    # (H, 3H)  bf16 W_hh^T  (columns r|z|n)
                        bhh_ref,    # (1, 3H)  f32  b_hh
                        out_ref,    # (T, H)   f32  per-step hidden states
                        gi_ref,     # (T, 3H)  f32  VMEM scratch: input projections
                        *,
                        hidden_size, seq_len):
    H = hidden_size

    # Phase 1 (parallel over time): batched input projection on the MXU.
    gi_ref[...] = (
        jnp.dot(x_ref[...].astype(jnp.bfloat16), wih_ref[...],
                preferred_element_type=jnp.float32)
        + bih_ref[...])

    # Phase 2 (sequential): GRU recurrence; hidden carried in vregs.
    def step(t, h):
        gi = gi_ref[pl.ds(t, 1), :]                                # (1, 3H) f32
        gh = jnp.dot(h.astype(jnp.bfloat16), whh_ref[...],
                     preferred_element_type=jnp.float32) + bhh_ref[...]
        r = jax.nn.sigmoid(gi[:, 0:H] + gh[:, 0:H])
        z = jax.nn.sigmoid(gi[:, H:2 * H] + gh[:, H:2 * H])
        n = jnp.tanh(gi[:, 2 * H:3 * H] + r * gh[:, 2 * H:3 * H])
        h_new = n + z * (h - n)                                    # == (1-z)*n + z*h
        out_ref[pl.ds(t, 1), :] = h_new
        return h_new

    jax.lax.fori_loop(0, seq_len, step, h0_ref[...],
                      unroll=min(seq_len, 8))


def init_params(key, input_size, hidden_size):
    """PyTorch-layout parameters: nn.Embedding(V,H) + nn.GRU(H,H) (1 layer)."""
    H = hidden_size
    k_emb, k_wih, k_whh, k_bih, k_bhh = jax.random.split(key, 5)
    scale = 1.0 / jnp.sqrt(jnp.float32(H))
    return {
        "embedding": jax.random.normal(k_emb, (input_size, H), jnp.float32),
        # nn.GRU weight_ih_l0 / weight_hh_l0 : (3H, H); bias_*: (3H,)
        "w_ih": jax.random.uniform(k_wih, (3 * H, H), jnp.float32, -scale, scale),
        "w_hh": jax.random.uniform(k_whh, (3 * H, H), jnp.float32, -scale, scale),
        "b_ih": jax.random.uniform(k_bih, (3 * H,), jnp.float32, -scale, scale),
        "b_hh": jax.random.uniform(k_bhh, (3 * H,), jnp.float32, -scale, scale),
    }


def prepare_params(params):
    """Transpose/cast parameters for the kernel (done once, outside hot loop)."""
    H = params["embedding"].shape[1]
    return {
        "hidden_size": H,
        "emb": params["embedding"].astype(jnp.float32),            # (V, H) f32
        "w_ih_t": params["w_ih"].T.astype(jnp.bfloat16),           # (H, 3H) bf16
        "w_hh_t": params["w_hh"].T.astype(jnp.bfloat16),           # (H, 3H) bf16
        "b_ih": params["b_ih"].reshape(1, -1).astype(jnp.float32),  # (1, 3H)
        "b_hh": params["b_hh"].reshape(1, -1).astype(jnp.float32),  # (1, 3H)
    }


def encode_sequence(tokens, hidden, prep):
    """Run T GRU steps inside one grid-less pallas_call.

    tokens: (T,) int32; hidden: (1,1,H) f32 or None.
    Returns (outputs (T,1,H) f32, hidden (1,1,H) f32) — nn.GRU semantics.
    """
    H = prep["hidden_size"]
    tokens = jnp.asarray(tokens, dtype=jnp.int32).reshape(-1)
    T = int(tokens.shape[0])

    if hidden is None:
        hidden = jnp.zeros((1, 1, H), dtype=jnp.float32)           # initHidden()
    h0 = hidden.reshape(1, H).astype(jnp.float32)

    # Embedding gather in the wrapper: only the T used rows ever reach VMEM.
    x_emb = prep["emb"][tokens]                                    # (T, H) f32

    kernel = functools.partial(_encoder_gru_kernel, hidden_size=H, seq_len=T)

    flops = int(2 * 2 * T * H * 3 * H)          # input proj + recurrent matmuls
    transcendentals = int(3 * T * H)
    bytes_accessed = int(x_emb.size * 4 + h0.size * 4
                         + prep["w_ih_t"].size * 2 + prep["w_hh_t"].size * 2
                         + prep["b_ih"].size * 4 + prep["b_hh"].size * 4
                         + T * H * 4)

    vmem_spec = pl.BlockSpec(memory_space=pltpu.MemorySpace.VMEM)
    outputs = pl.pallas_call(
        kernel,
        out_shape=jax.ShapeDtypeStruct((T, H), jnp.float32),
        in_specs=[vmem_spec] * 6,
        out_specs=vmem_spec,
        scratch_shapes=[pltpu.VMEM((T, 3 * H), jnp.float32)],
        cost_estimate=pl.CostEstimate(
            flops=flops, transcendentals=transcendentals,
            bytes_accessed=bytes_accessed),
    )(x_emb, h0, prep["w_ih_t"], prep["b_ih"], prep["w_hh_t"], prep["b_hh"])

    outputs = outputs.reshape(T, 1, H)
    hidden_out = outputs[-1].reshape(1, 1, H)   # 1-layer GRU: last output == hidden
    return outputs, hidden_out
    # TODO(synk): for very long sequences, chunk T into C-step blocks with a
    # carried-hidden VMEM scratch across grid steps instead of one giant block.


def encoder_rnn_forward(input_token, hidden, prep):
    """Module-equivalent forward: single token -> (outputs (1,1,H), hidden (1,1,H))."""
    tokens = jnp.asarray(input_token, dtype=jnp.int32).reshape((1,))
    return encode_sequence(tokens, hidden, prep)


def _reference_sequence(tokens, hidden, params):
    """Pure-JAX GRU reference (PyTorch semantics), same bf16 weight rounding."""
    H = params["embedding"].shape[1]
    emb = params["embedding"].astype(jnp.float32)
    w_ih_t = params["w_ih"].T.astype(jnp.bfloat16)
    w_hh_t = params["w_hh"].T.astype(jnp.bfloat16)
    b_ih = params["b_ih"].reshape(1, -1).astype(jnp.float32)
    b_hh = params["b_hh"].reshape(1, -1).astype(jnp.float32)

    tokens = jnp.asarray(tokens, dtype=jnp.int32).reshape(-1)
    T = int(tokens.shape[0])
    h = (jnp.zeros((1, H), jnp.float32) if hidden is None
         else hidden.reshape(1, H).astype(jnp.float32))

    x = emb[tokens]                                                # (T, H)
    gi_all = jnp.dot(x.astype(jnp.bfloat16), w_ih_t,
                     preferred_element_type=jnp.float32) + b_ih    # (T, 3H)
    outs = []
    for t in range(T):
        gi = gi_all[t:t + 1]
        gh = jnp.dot(h.astype(jnp.bfloat16), w_hh_t,
                     preferred_element_type=jnp.float32) + b_hh
        r = jax.nn.sigmoid(gi[:, :H] + gh[:, :H])
        z = jax.nn.sigmoid(gi[:, H:2 * H] + gh[:, H:2 * H])
        n = jnp.tanh(gi[:, 2 * H:] + r * gh[:, 2 * H:])
        h = (1.0 - z) * n + z * h
        outs.append(h)
    outputs = jnp.stack(outs, axis=0).reshape(T, 1, H)
    return outputs, h.reshape(1, 1, H)


if __name__ == "__main__":
    VOCAB = 64          # input_size
    HIDDEN = 128        # hidden_size (lane-aligned)
    SEQ_LEN = 8

    key = jax.random.PRNGKey(0)
    k_params, k_tok, k_hid = jax.random.split(key, 3)

    params = init_params(k_params, VOCAB, HIDDEN)
    prep = prepare_params(params)

    tokens = jax.random.randint(k_tok, (SEQ_LEN,), 0, VOCAB, dtype=jnp.int32)
    hidden0 = jax.random.normal(k_hid, (1, 1, HIDDEN), jnp.float32)

    # Full-sequence encode inside a single (grid-less) pallas_call.
    outputs, hidden = encode_sequence(tokens, hidden0, prep)
    jax.block_until_ready((outputs, hidden))

    # Module-equivalent single-token forward (hidden=None -> initHidden()).
    out1, hid1 = encoder_rnn_forward(tokens[0], None, prep)
    jax.block_until_ready((out1, hid1))

    # Correctness vs. pure-JAX reference.
    ref_out, ref_hid = _reference_sequence(tokens, hidden0, params)
    ref_out1, ref_hid1 = _reference_sequence(tokens[:1], None, params)

    assert outputs.shape == (SEQ_LEN, 1, HIDDEN)
    assert hidden.shape == (1, 1, HIDDEN)
    assert out1.shape == (1, 1, HIDDEN) and hid1.shape == (1, 1, HIDDEN)
    assert jnp.allclose(outputs, ref_out, atol=2e-3, rtol=2e-3)
    assert jnp.allclose(hidden, ref_hid, atol=2e-3, rtol=2e-3)
    assert jnp.allclose(out1, ref_out1, atol=2e-3, rtol=2e-3)
    assert jnp.allclose(hid1, ref_hid1, atol=2e-3, rtol=2e-3)

    print("KERNEL_OK")
</pallas_src>

<mosaic_0001>
module attributes {stable_mosaic.version = 11 : i64} {
  func.func @_encoder_gru_kernel(%arg0: memref<8x128xf32, #tpu.memory_space<vmem>>, %arg1: memref<1x128xf32, #tpu.memory_space<vmem>>, %arg2: memref<128x384xbf16, #tpu.memory_space<vmem>>, %arg3: memref<1x384xf32, #tpu.memory_space<vmem>>, %arg4: memref<128x384xbf16, #tpu.memory_space<vmem>>, %arg5: memref<1x384xf32, #tpu.memory_space<vmem>>, %arg6: memref<8x128xf32, #tpu.memory_space<vmem>>, %arg7: memref<8x384xf32, #tpu.memory_space<vmem>>) attributes {dimension_semantics = [], scalar_prefetch = 0 : i64, scratch_operands = 1 : i64, tpu.core_type = #tpu.core_type<tc>} {
    %c0 = arith.constant 0 : index
    %c0_0 = arith.constant 0 : index
    %0 = vector.load %arg0[%c0, %c0_0] : memref<8x128xf32, #tpu.memory_space<vmem>>, vector<8x128xf32>
    %1 = arith.truncf %0 : vector<8x128xf32> to vector<8x128xbf16>
    %c0_1 = arith.constant 0 : index
    %c0_2 = arith.constant 0 : index
    %2 = vector.load %arg2[%c0_1, %c0_2] : memref<128x384xbf16, #tpu.memory_space<vmem>>, vector<128x384xbf16>
    %cst = arith.constant dense<0.000000e+00> : vector<8x384xf32>
    %3 = tpu.matmul %1, %2, %cst {dimension_numbers = #tpu.dot_dimension_numbers<[1], [0], [0], [1], [0, 0, 1, 1], [], []>} : vector<8x128xbf16>, vector<128x384xbf16>, vector<8x384xf32> -> vector<8x384xf32>
    %c0_3 = arith.constant 0 : index
    %c0_4 = arith.constant 0 : index
    %4 = vector.load %arg3[%c0_3, %c0_4] : memref<1x384xf32, #tpu.memory_space<vmem>>, vector<1x384xf32>
    %5 = vector.broadcast %4 : vector<1x384xf32> to vector<8x384xf32>
    %6 = arith.addf %3, %5 : vector<8x384xf32>
    %c0_5 = arith.constant 0 : index
    %c0_6 = arith.constant 0 : index
    %7 = vector.load %arg7[%c0_5, %c0_6] : memref<8x384xf32, #tpu.memory_space<vmem>>, vector<8x384xf32>
    tpu.vector_store %arg7[%c0_5, %c0_6], %6 {strides = array<i32>} : memref<8x384xf32, #tpu.memory_space<vmem>>, vector<8x384xf32>,
    %c0_7 = arith.constant 0 : index
    %c0_8 = arith.constant 0 : index
    %8 = vector.load %arg1[%c0_7, %c0_8] : memref<1x128xf32, #tpu.memory_space<vmem>>, vector<1x128xf32>
    %c0_i32 = arith.constant 0 : i32
    %9 = arith.index_cast %c0_i32 : i32 to index
    %c0_9 = arith.constant 0 : index
    %10 = vector.load %arg7[%9, %c0_9] : memref<8x384xf32, #tpu.memory_space<vmem>>, vector<1x384xf32>
    %11 = arith.truncf %8 : vector<1x128xf32> to vector<1x128xbf16>
    %c0_10 = arith.constant 0 : index
    %c0_11 = arith.constant 0 : index
    %12 = vector.load %arg4[%c0_10, %c0_11] : memref<128x384xbf16, #tpu.memory_space<vmem>>, vector<128x384xbf16>
    %cst_12 = arith.constant dense<0.000000e+00> : vector<1x384xf32>
    %13 = tpu.matmul %11, %12, %cst_12 {dimension_numbers = #tpu.dot_dimension_numbers<[1], [0], [0], [1], [0, 0, 1, 1], [], []>} : vector<1x128xbf16>, vector<128x384xbf16>, vector<1x384xf32> -> vector<1x384xf32>
    %c0_13 = arith.constant 0 : index
    %c0_14 = arith.constant 0 : index
    %14 = vector.load %arg5[%c0_13, %c0_14] : memref<1x384xf32, #tpu.memory_space<vmem>>, vector<1x384xf32>
    %15 = arith.addf %13, %14 : vector<1x384xf32>
    %16 = vector.extract_strided_slice %10 {offsets = [0, 0], sizes = [1, 128], strides = [1, 1]} : vector<1x384xf32> to vector<1x128xf32>
    %17 = vector.extract_strided_slice %15 {offsets = [0, 0], sizes = [1, 128], strides = [1, 1]} : vector<1x384xf32> to vector<1x128xf32>
    %18 = arith.addf %16, %17 : vector<1x128xf32>
    %19 = arith.negf %18 : vector<1x128xf32>
    %20 = math.exp %19 : vector<1x128xf32>
    %cst_15 = arith.constant 1.000000e+00 : f32
    %21 = vector.broadcast %cst_15 : f32 to vector<1x128xf32>
    %22 = arith.addf %21, %20 : vector<1x128xf32>
    %23 = arith.divf %21, %22 : vector<1x128xf32>
    %24 = vector.extract_strided_slice %10 {offsets = [0, 128], sizes = [1, 128], strides = [1, 1]} : vector<1x384xf32> to vector<1x128xf32>
    %25 = vector.extract_strided_slice %15 {offsets = [0, 128], sizes = [1, 128], strides = [1, 1]} : vector<1x384xf32> to vector<1x128xf32>
    %26 = arith.addf %24, %25 : vector<1x128xf32>
    %27 = arith.negf %26 : vector<1x128xf32>
    %28 = math.exp %27 : vector<1x128xf32>
    %cst_16 = arith.constant 1.000000e+00 : f32
    %29 = vector.broadcast %cst_16 : f32 to vector<1x128xf32>
    %30 = arith.addf %29, %28 : vector<1x128xf32>
    %31 = arith.divf %29, %30 : vector<1x128xf32>
    %32 = vector.extract_strided_slice %10 {offsets = [0, 256], sizes = [1, 128], strides = [1, 1]} : vector<1x384xf32> to vector<1x128xf32>
    %33 = vector.extract_strided_slice %15 {offsets = [0, 256], sizes = [1, 128], strides = [1, 1]} : vector<1x384xf32> to vector<1x128xf32>
    %34 = arith.mulf %23, %33 : vector<1x128xf32>
    %35 = arith.addf %32, %34 : vector<1x128xf32>
    %36 = math.tanh %35 : vector<1x128xf32>
    %37 = arith.subf %8, %36 : vector<1x128xf32>
    %38 = arith.mulf %31, %37 : vector<1x128xf32>
    %39 = arith.addf %36, %38 : vector<1x128xf32>
    %40 = arith.index_cast %c0_i32 : i32 to index
    %c0_17 = arith.constant 0 : index
    %41 = vector.load %arg6[%40, %c0_17] : memref<8x128xf32, #tpu.memory_space<vmem>>, vector<1x128xf32>
    tpu.vector_store %arg6[%40, %c0_17], %39 {strides = array<i32>} : memref<8x128xf32, #tpu.memory_space<vmem>>, vector<1x128xf32>,
    %c1_i32 = arith.constant 1 : i32
    %42 = arith.index_cast %c1_i32 : i32 to index
    %c0_18 = arith.constant 0 : index
    %43 = vector.load %arg7[%42, %c0_18] : memref<8x384xf32, #tpu.memory_space<vmem>>, vector<1x384xf32>
    %44 = arith.truncf %39 : vector<1x128xf32> to vector<1x128xbf16>
    %c0_19 = arith.constant 0 : index
    %c0_20 = arith.constant 0 : index
    %45 = vector.load %arg4[%c0_19, %c0_20] : memref<128x384xbf16, #tpu.memory_space<vmem>>, vector<128x384xbf16>
    %cst_21 = arith.constant dense<0.000000e+00> : vector<1x384xf32>
    %46 = tpu.matmul %44, %45, %cst_21 {dimension_numbers = #tpu.dot_dimension_numbers<[1], [0], [0], [1], [0, 0, 1, 1], [], []>} : vector<1x128xbf16>, vector<128x384xbf16>, vector<1x384xf32> -> vector<1x384xf32>
    %c0_22 = arith.constant 0 : index
    %c0_23 = arith.constant 0 : index
    %47 = vector.load %arg5[%c0_22, %c0_23] : memref<1x384xf32, #tpu.memory_space<vmem>>, vector<1x384xf32>
    %48 = arith.addf %46, %47 : vector<1x384xf32>
    %49 = vector.extract_strided_slice %43 {offsets = [0, 0], sizes = [1, 128], strides = [1, 1]} : vector<1x384xf32> to vector<1x128xf32>
    %50 = vector.extract_strided_slice %48 {offsets = [0, 0], sizes = [1, 128], strides = [1, 1]} : vector<1x384xf32> to vector<1x128xf32>
    %51 = arith.addf %49, %50 : vector<1x128xf32>
    %52 = arith.negf %51 : vector<1x128xf32>
    %53 = math.exp %52 : vector<1x128xf32>
    %cst_24 = arith.constant 1.000000e+00 : f32
    %54 = vector.broadcast %cst_24 : f32 to vector<1x128xf32>
    %55 = arith.addf %54, %53 : vector<1x128xf32>
    %56 = arith.divf %54, %55 : vector<1x128xf32>
    %57 = vector.extract_strided_slice %43 {offsets = [0, 128], sizes = [1, 128], strides = [1, 1]} : vector<1x384xf32> to vector<1x128xf32>
    %58 = vector.extract_strided_slice %48 {offsets = [0, 128], sizes = [1, 128], strides = [1, 1]} : vector<1x384xf32> to vector<1x128xf32>
    %59 = arith.addf %57, %58 : vector<1x128xf32>
    %60 = arith.negf %59 : vector<1x128xf32>
    %61 = math.exp %60 : vector<1x128xf32>
    %cst_25 = arith.constant 1.000000e+00 : f32
    %62 = vector.broadcast %cst_25 : f32 to vector<1x128xf32>
    %63 = arith.addf %62, %61 : vector<1x128xf32>
    %64 = arith.divf %62, %63 : vector<1x128xf32>
    %65 = vector.extract_strided_slice %43 {offsets = [0, 256], sizes = [1, 128], strides = [1, 1]} : vector<1x384xf32> to vector<1x128xf32>
    %66 = vector.extract_strided_slice %48 {offsets = [0, 256], sizes = [1, 128], strides = [1, 1]} : vector<1x384xf32> to vector<1x128xf32>
    %67 = arith.mulf %56, %66 : vector<1x128xf32>
    %68 = arith.addf %65, %67 : vector<1x128xf32>
    %69 = math.tanh %68 : vector<1x128xf32>
    %70 = arith.subf %39, %69 : vector<1x128xf32>
    %71 = arith.mulf %64, %70 : vector<1x128xf32>
    %72 = arith.addf %69, %71 : vector<1x128xf32>
    %73 = arith.index_cast %c1_i32 : i32 to index
    %c0_26 = arith.constant 0 : index
    %74 = vector.load %arg6[%73, %c0_26] : memref<8x128xf32, #tpu.memory_space<vmem>>, vector<1x128xf32>
    tpu.vector_store %arg6[%73, %c0_26], %72 {strides = array<i32>} : memref<8x128xf32, #tpu.memory_space<vmem>>, vector<1x128xf32>,
    %c2_i32 = arith.constant 2 : i32
    %75 = arith.index_cast %c2_i32 : i32 to index
    %c0_27 = arith.constant 0 : index
    %76 = vector.load %arg7[%75, %c0_27] : memref<8x384xf32, #tpu.memory_space<vmem>>, vector<1x384xf32>
    %77 = arith.truncf %72 : vector<1x128xf32> to vector<1x128xbf16>
    %c0_28 = arith.constant 0 : index
    %c0_29 = arith.constant 0 : index
    %78 = vector.load %arg4[%c0_28, %c0_29] : memref<128x384xbf16, #tpu.memory_space<vmem>>, vector<128x384xbf16>
    %cst_30 = arith.constant dense<0.000000e+00> : vector<1x384xf32>
    %79 = tpu.matmul %77, %78, %cst_30 {dimension_numbers = #tpu.dot_dimension_numbers<[1], [0], [0], [1], [0, 0, 1, 1], [], []>} : vector<1x128xbf16>, vector<128x384xbf16>, vector<1x384xf32> -> vector<1x384xf32>
    %c0_31 = arith.constant 0 : index
    %c0_32 = arith.constant 0 : index
    %80 = vector.load %arg5[%c0_31, %c0_32] : memref<1x384xf32, #tpu.memory_space<vmem>>, vector<1x384xf32>
    %81 = arith.addf %79, %80 : vector<1x384xf32>
    %82 = vector.extract_strided_slice %76 {offsets = [0, 0], sizes = [1, 128], strides = [1, 1]} : vector<1x384xf32> to vector<1x128xf32>
    %83 = vector.extract_strided_slice %81 {offsets = [0, 0], sizes = [1, 128], strides = [1, 1]} : vector<1x384xf32> to vector<1x128xf32>
    %84 = arith.addf %82, %83 : vector<1x128xf32>
    %85 = arith.negf %84 : vector<1x128xf32>
    %86 = math.exp %85 : vector<1x128xf32>
    %cst_33 = arith.constant 1.000000e+00 : f32
    %87 = vector.broadcast %cst_33 : f32 to vector<1x128xf32>
    %88 = arith.addf %87, %86 : vector<1x128xf32>
    %89 = arith.divf %87, %88 : vector<1x128xf32>
    %90 = vector.extract_strided_slice %76 {offsets = [0, 128], sizes = [1, 128], strides = [1, 1]} : vector<1x384xf32> to vector<1x128xf32>
    %91 = vector.extract_strided_slice %81 {offsets = [0, 128], sizes = [1, 128], strides = [1, 1]} : vector<1x384xf32> to vector<1x128xf32>
    %92 = arith.addf %90, %91 : vector<1x128xf32>
    %93 = arith.negf %92 : vector<1x128xf32>
    %94 = math.exp %93 : vector<1x128xf32>
    %cst_34 = arith.constant 1.000000e+00 : f32
    %95 = vector.broadcast %cst_34 : f32 to vector<1x128xf32>
    %96 = arith.addf %95, %94 : vector<1x128xf32>
    %97 = arith.divf %95, %96 : vector<1x128xf32>
    %98 = vector.extract_strided_slice %76 {offsets = [0, 256], sizes = [1, 128], strides = [1, 1]} : vector<1x384xf32> to vector<1x128xf32>
    %99 = vector.extract_strided_slice %81 {offsets = [0, 256], sizes = [1, 128], strides = [1, 1]} : vector<1x384xf32> to vector<1x128xf32>
    %100 = arith.mulf %89, %99 : vector<1x128xf32>
    %101 = arith.addf %98, %100 : vector<1x128xf32>
    %102 = math.tanh %101 : vector<1x128xf32>
    %103 = arith.subf %72, %102 : vector<1x128xf32>
    %104 = arith.mulf %97, %103 : vector<1x128xf32>
    %105 = arith.addf %102, %104 : vector<1x128xf32>
    %106 = arith.index_cast %c2_i32 : i32 to index
    %c0_35 = arith.constant 0 : index
    %107 = vector.load %arg6[%106, %c0_35] : memref<8x128xf32, #tpu.memory_space<vmem>>, vector<1x128xf32>
    tpu.vector_store %arg6[%106, %c0_35], %105 {strides = array<i32>} : memref<8x128xf32, #tpu.memory_space<vmem>>, vector<1x128xf32>,
    %c3_i32 = arith.constant 3 : i32
    %108 = arith.index_cast %c3_i32 : i32 to index
    %c0_36 = arith.constant 0 : index
    %109 = vector.load %arg7[%108, %c0_36] : memref<8x384xf32, #tpu.memory_space<vmem>>, vector<1x384xf32>
    %110 = arith.truncf %105 : vector<1x128xf32> to vector<1x128xbf16>
    %c0_37 = arith.constant 0 : index
    %c0_38 = arith.constant 0 : index
    %111 = vector.load %arg4[%c0_37, %c0_38] : memref<128x384xbf16, #tpu.memory_space<vmem>>, vector<128x384xbf16>
    %cst_39 = arith.constant dense<0.000000e+00> : vector<1x384xf32>
    %112 = tpu.matmul %110, %111, %cst_39 {dimension_numbers = #tpu.dot_dimension_numbers<[1], [0], [0], [1], [0, 0, 1, 1], [], []>} : vector<1x128xbf16>, vector<128x384xbf16>, vector<1x384xf32> -> vector<1x384xf32>
    %c0_40 = arith.constant 0 : index
    %c0_41 = arith.constant 0 : index
    %113 = vector.load %arg5[%c0_40, %c0_41] : memref<1x384xf32, #tpu.memory_space<vmem>>, vector<1x384xf32>
    %114 = arith.addf %112, %113 : vector<1x384xf32>
    %115 = vector.extract_strided_slice %109 {offsets = [0, 0], sizes = [1, 128], strides = [1, 1]} : vector<1x384xf32> to vector<1x128xf32>
    %116 = vector.extract_strided_slice %114 {offsets = [0, 0], sizes = [1, 128], strides = [1, 1]} : vector<1x384xf32> to vector<1x128xf32>
    %117 = arith.addf %115, %116 : vector<1x128xf32>
    %118 = arith.negf %117 : vector<1x128xf32>
    %119 = math.exp %118 : vector<1x128xf32>
    %cst_42 = arith.constant 1.000000e+00 : f32
    %120 = vector.broadcast %cst_42 : f32 to vector<1x128xf32>
    %121 = arith.addf %120, %119 : vector<1x128xf32>
    %122 = arith.divf %120, %121 : vector<1x128xf32>
    %123 = vector.extract_strided_slice %109 {offsets = [0, 128], sizes = [1, 128], strides = [1, 1]} : vector<1x384xf32> to vector<1x128xf32>
    %124 = vector.extract_strided_slice %114 {offsets = [0, 128], sizes = [1, 128], strides = [1, 1]} : vector<1x384xf32> to vector<1x128xf32>
    %125 = arith.addf %123, %124 : vector<1x128xf32>
    %126 = arith.negf %125 : vector<1x128xf32>
    %127 = math.exp %126 : vector<1x128xf32>
    %cst_43 = arith.constant 1.000000e+00 : f32
    %128 = vector.broadcast %cst_43 : f32 to vector<1x128xf32>
    %129 = arith.addf %128, %127 : vector<1x128xf32>
    %130 = arith.divf %128, %129 : vector<1x128xf32>
    %131 = vector.extract_strided_slice %109 {offsets = [0, 256], sizes = [1, 128], strides = [1, 1]} : vector<1x384xf32> to vector<1x128xf32>
    %132 = vector.extract_strided_slice %114 {offsets = [0, 256], sizes = [1, 128], strides = [1, 1]} : vector<1x384xf32> to vector<1x128xf32>
    %133 = arith.mulf %122, %132 : vector<1x128xf32>
    %134 = arith.addf %131, %133 : vector<1x128xf32>
    %135 = math.tanh %134 : vector<1x128xf32>
    %136 = arith.subf %105, %135 : vector<1x128xf32>
    %137 = arith.mulf %130, %136 : vector<1x128xf32>
    %138 = arith.addf %135, %137 : vector<1x128xf32>
    %139 = arith.index_cast %c3_i32 : i32 to index
    %c0_44 = arith.constant 0 : index
    %140 = vector.load %arg6[%139, %c0_44] : memref<8x128xf32, #tpu.memory_space<vmem>>, vector<1x128xf32>
    tpu.vector_store %arg6[%139, %c0_44], %138 {strides = array<i32>} : memref<8x128xf32, #tpu.memory_space<vmem>>, vector<1x128xf32>,
    %c4_i32 = arith.constant 4 : i32
    %141 = arith.index_cast %c4_i32 : i32 to index
    %c0_45 = arith.constant 0 : index
    %142 = vector.load %arg7[%141, %c0_45] : memref<8x384xf32, #tpu.memory_space<vmem>>, vector<1x384xf32>
    %143 = arith.truncf %138 : vector<1x128xf32> to vector<1x128xbf16>
    %c0_46 = arith.constant 0 : index
    %c0_47 = arith.constant 0 : index
    %144 = vector.load %arg4[%c0_46, %c0_47] : memref<128x384xbf16, #tpu.memory_space<vmem>>, vector<128x384xbf16>
    %cst_48 = arith.constant dense<0.000000e+00> : vector<1x384xf32>
    %145 = tpu.matmul %143, %144, %cst_48 {dimension_numbers = #tpu.dot_dimension_numbers<[1], [0], [0], [1], [0, 0, 1, 1], [], []>} : vector<1x128xbf16>, vector<128x384xbf16>, vector<1x384xf32> -> vector<1x384xf32>
    %c0_49 = arith.constant 0 : index
    %c0_50 = arith.constant 0 : index
    %146 = vector.load %arg5[%c0_49, %c0_50] : memref<1x384xf32, #tpu.memory_space<vmem>>, vector<1x384xf32>
    %147 = arith.addf %145, %146 : vector<1x384xf32>
    %148 = vector.extract_strided_slice %142 {offsets = [0, 0], sizes = [1, 128], strides = [1, 1]} : vector<1x384xf32> to vector<1x128xf32>
    %149 = vector.extract_strided_slice %147 {offsets = [0, 0], sizes = [1, 128], strides = [1, 1]} : vector<1x384xf32> to vector<1x128xf32>
    %150 = arith.addf %148, %149 : vector<1x128xf32>
    %151 = arith.negf %150 : vector<1x128xf32>
    %152 = math.exp %151 : vector<1x128xf32>
    %cst_51 = arith.constant 1.000000e+00 : f32
    %153 = vector.broadcast %cst_51 : f32 to vector<1x128xf32>
    %154 = arith.addf %153, %152 : vector<1x128xf32>
    %155 = arith.divf %153, %154 : vector<1x128xf32>
    %156 = vector.extract_strided_slice %142 {offsets = [0, 128], sizes = [1, 128], strides = [1, 1]} : vector<1x384xf32> to vector<1x128xf32>
    %157 = vector.extract_strided_slice %147 {offsets = [0, 128], sizes = [1, 128], strides = [1, 1]} : vector<1x384xf32> to vector<1x128xf32>
    %158 = arith.addf %156, %157 : vector<1x128xf32>
    %159 = arith.negf %158 : vector<1x128xf32>
    %160 = math.exp %159 : vector<1x128xf32>
    %cst_52 = arith.constant 1.000000e+00 : f32
    %161 = vector.broadcast %cst_52 : f32 to vector<1x128xf32>
    %162 = arith.addf %161, %160 : vector<1x128xf32>
    %163 = arith.divf %161, %162 : vector<1x128xf32>
    %164 = vector.extract_strided_slice %142 {offsets = [0, 256], sizes = [1, 128], strides = [1, 1]} : vector<1x384xf32> to vector<1x128xf32>
    %165 = vector.extract_strided_slice %147 {offsets = [0, 256], sizes = [1, 128], strides = [1, 1]} : vector<1x384xf32> to vector<1x128xf32>
    %166 = arith.mulf %155, %165 : vector<1x128xf32>
    %167 = arith.addf %164, %166 : vector<1x128xf32>
    %168 = math.tanh %167 : vector<1x128xf32>
    %169 = arith.subf %138, %168 : vector<1x128xf32>
    %170 = arith.mulf %163, %169 : vector<1x128xf32>
    %171 = arith.addf %168, %170 : vector<1x128xf32>
    %172 = arith.index_cast %c4_i32 : i32 to index
    %c0_53 = arith.constant 0 : index
    %173 = vector.load %arg6[%172, %c0_53] : memref<8x128xf32, #tpu.memory_space<vmem>>, vector<1x128xf32>
    tpu.vector_store %arg6[%172, %c0_53], %171 {strides = array<i32>} : memref<8x128xf32, #tpu.memory_space<vmem>>, vector<1x128xf32>,
    %c5_i32 = arith.constant 5 : i32
    %174 = arith.index_cast %c5_i32 : i32 to index
    %c0_54 = arith.constant 0 : index
    %175 = vector.load %arg7[%174, %c0_54] : memref<8x384xf32, #tpu.memory_space<vmem>>, vector<1x384xf32>
    %176 = arith.truncf %171 : vector<1x128xf32> to vector<1x128xbf16>
    %c0_55 = arith.constant 0 : index
    %c0_56 = arith.constant 0 : index
    %177 = vector.load %arg4[%c0_55, %c0_56] : memref<128x384xbf16, #tpu.memory_space<vmem>>, vector<128x384xbf16>
    %cst_57 = arith.constant dense<0.000000e+00> : vector<1x384xf32>
    %178 = tpu.matmul %176, %177, %cst_57 {dimension_numbers = #tpu.dot_dimension_numbers<[1], [0], [0], [1], [0, 0, 1, 1], [], []>} : vector<1x128xbf16>, vector<128x384xbf16>, vector<1x384xf32> -> vector<1x384xf32>
    %c0_58 = arith.constant 0 : index
    %c0_59 = arith.constant 0 : index
    %179 = vector.load %arg5[%c0_58, %c0_59] : memref<1x384xf32, #tpu.memory_space<vmem>>, vector<1x384xf32>
    %180 = arith.addf %178, %179 : vector<1x384xf32>
    %181 = vector.extract_strided_slice %175 {offsets = [0, 0], sizes = [1, 128], strides = [1, 1]} : vector<1x384xf32> to vector<1x128xf32>
    %182 = vector.extract_strided_slice %180 {offsets = [0, 0], sizes = [1, 128], strides = [1, 1]} : vector<1x384xf32> to vector<1x128xf32>
    %183 = arith.addf %181, %182 : vector<1x128xf32>
    %184 = arith.negf %183 : vector<1x128xf32>
    %185 = math.exp %184 : vector<1x128xf32>
    %cst_60 = arith.constant 1.000000e+00 : f32
    %186 = vector.broadcast %cst_60 : f32 to vector<1x128xf32>
    %187 = arith.addf %186, %185 : vector<1x128xf32>
    %188 = arith.divf %186, %187 : vector<1x128xf32>
    %189 = vector.extract_strided_slice %175 {offsets = [0, 128], sizes = [1, 128], strides = [1, 1]} : vector<1x384xf32> to vector<1x128xf32>
    %190 = vector.extract_strided_slice %180 {offsets = [0, 128], sizes = [1, 128], strides = [1, 1]} : vector<1x384xf32> to vector<1x128xf32>
    %191 = arith.addf %189, %190 : vector<1x128xf32>
    %192 = arith.negf %191 : vector<1x128xf32>
    %193 = math.exp %192 : vector<1x128xf32>
    %cst_61 = arith.constant 1.000000e+00 : f32
    %194 = vector.broadcast %cst_61 : f32 to vector<1x128xf32>
    %195 = arith.addf %194, %193 : vector<1x128xf32>
    %196 = arith.divf %194, %195 : vector<1x128xf32>
    %197 = vector.extract_strided_slice %175 {offsets = [0, 256], sizes = [1, 128], strides = [1, 1]} : vector<1x384xf32> to vector<1x128xf32>
    %198 = vector.extract_strided_slice %180 {offsets = [0, 256], sizes = [1, 128], strides = [1, 1]} : vector<1x384xf32> to vector<1x128xf32>
    %199 = arith.mulf %188, %198 : vector<1x128xf32>
    %200 = arith.addf %197, %199 : vector<1x128xf32>
    %201 = math.tanh %200 : vector<1x128xf32>
    %202 = arith.subf %171, %201 : vector<1x128xf32>
    %203 = arith.mulf %196, %202 : vector<1x128xf32>
    %204 = arith.addf %201, %203 : vector<1x128xf32>
    %205 = arith.index_cast %c5_i32 : i32 to index
    %c0_62 = arith.constant 0 : index
    %206 = vector.load %arg6[%205, %c0_62] : memref<8x128xf32, #tpu.memory_space<vmem>>, vector<1x128xf32>
    tpu.vector_store %arg6[%205, %c0_62], %204 {strides = array<i32>} : memref<8x128xf32, #tpu.memory_space<vmem>>, vector<1x128xf32>,
    %c6_i32 = arith.constant 6 : i32
    %207 = arith.index_cast %c6_i32 : i32 to index
    %c0_63 = arith.constant 0 : index
    %208 = vector.load %arg7[%207, %c0_63] : memref<8x384xf32, #tpu.memory_space<vmem>>, vector<1x384xf32>
    %209 = arith.truncf %204 : vector<1x128xf32> to vector<1x128xbf16>
    %c0_64 = arith.constant 0 : index
    %c0_65 = arith.constant 0 : index
    %210 = vector.load %arg4[%c0_64, %c0_65] : memref<128x384xbf16, #tpu.memory_space<vmem>>, vector<128x384xbf16>
    %cst_66 = arith.constant dense<0.000000e+00> : vector<1x384xf32>
    %211 = tpu.matmul %209, %210, %cst_66 {dimension_numbers = #tpu.dot_dimension_numbers<[1], [0], [0], [1], [0, 0, 1, 1], [], []>} : vector<1x128xbf16>, vector<128x384xbf16>, vector<1x384xf32> -> vector<1x384xf32>
    %c0_67 = arith.constant 0 : index
    %c0_68 = arith.constant 0 : index
    %212 = vector.load %arg5[%c0_67, %c0_68] : memref<1x384xf32, #tpu.memory_space<vmem>>, vector<1x384xf32>
    %213 = arith.addf %211, %212 : vector<1x384xf32>
    %214 = vector.extract_strided_slice %208 {offsets = [0, 0], sizes = [1, 128], strides = [1, 1]} : vector<1x384xf32> to vector<1x128xf32>
    %215 = vector.extract_strided_slice %213 {offsets = [0, 0], sizes = [1, 128], strides = [1, 1]} : vector<1x384xf32> to vector<1x128xf32>
    %216 = arith.addf %214, %215 : vector<1x128xf32>
    %217 = arith.negf %216 : vector<1x128xf32>
    %218 = math.exp %217 : vector<1x128xf32>
    %cst_69 = arith.constant 1.000000e+00 : f32
    %219 = vector.broadcast %cst_69 : f32 to vector<1x128xf32>
    %220 = arith.addf %219, %218 : vector<1x128xf32>
    %221 = arith.divf %219, %220 : vector<1x128xf32>
    %222 = vector.extract_strided_slice %208 {offsets = [0, 128], sizes = [1, 128], strides = [1, 1]} : vector<1x384xf32> to vector<1x128xf32>
    %223 = vector.extract_strided_slice %213 {offsets = [0, 128], sizes = [1, 128], strides = [1, 1]} : vector<1x384xf32> to vector<1x128xf32>
    %224 = arith.addf %222, %223 : vector<1x128xf32>
    %225 = arith.negf %224 : vector<1x128xf32>
    %226 = math.exp %225 : vector<1x128xf32>
    %cst_70 = arith.constant 1.000000e+00 : f32
    %227 = vector.broadcast %cst_70 : f32 to vector<1x128xf32>
    %228 = arith.addf %227, %226 : vector<1x128xf32>
    %229 = arith.divf %227, %228 : vector<1x128xf32>
    %230 = vector.extract_strided_slice %208 {offsets = [0, 256], sizes = [1, 128], strides = [1, 1]} : vector<1x384xf32> to vector<1x128xf32>
    %231 = vector.extract_strided_slice %213 {offsets = [0, 256], sizes = [1, 128], strides = [1, 1]} : vector<1x384xf32> to vector<1x128xf32>
    %232 = arith.mulf %221, %231 : vector<1x128xf32>
    %233 = arith.addf %230, %232 : vector<1x128xf32>
    %234 = math.tanh %233 : vector<1x128xf32>
    %235 = arith.subf %204, %234 : vector<1x128xf32>
    %236 = arith.mulf %229, %235 : vector<1x128xf32>
    %237 = arith.addf %234, %236 : vector<1x128xf32>
    %238 = arith.index_cast %c6_i32 : i32 to index
    %c0_71 = arith.constant 0 : index
    %239 = vector.load %arg6[%238, %c0_71] : memref<8x128xf32, #tpu.memory_space<vmem>>, vector<1x128xf32>
    tpu.vector_store %arg6[%238, %c0_71], %237 {strides = array<i32>} : memref<8x128xf32, #tpu.memory_space<vmem>>, vector<1x128xf32>,
    %c7_i32 = arith.constant 7 : i32
    %240 = arith.index_cast %c7_i32 : i32 to index
    %c0_72 = arith.constant 0 : index
    %241 = vector.load %arg7[%240, %c0_72] : memref<8x384xf32, #tpu.memory_space<vmem>>, vector<1x384xf32>
    %242 = arith.truncf %237 : vector<1x128xf32> to vector<1x128xbf16>
    %c0_73 = arith.constant 0 : index
    %c0_74 = arith.constant 0 : index
    %243 = vector.load %arg4[%c0_73, %c0_74] : memref<128x384xbf16, #tpu.memory_space<vmem>>, vector<128x384xbf16>
    %cst_75 = arith.constant dense<0.000000e+00> : vector<1x384xf32>
    %244 = tpu.matmul %242, %243, %cst_75 {dimension_numbers = #tpu.dot_dimension_numbers<[1], [0], [0], [1], [0, 0, 1, 1], [], []>} : vector<1x128xbf16>, vector<128x384xbf16>, vector<1x384xf32> -> vector<1x384xf32>
    %c0_76 = arith.constant 0 : index
    %c0_77 = arith.constant 0 : index
    %245 = vector.load %arg5[%c0_76, %c0_77] : memref<1x384xf32, #tpu.memory_space<vmem>>, vector<1x384xf32>
    %246 = arith.addf %244, %245 : vector<1x384xf32>
    %247 = vector.extract_strided_slice %241 {offsets = [0, 0], sizes = [1, 128], strides = [1, 1]} : vector<1x384xf32> to vector<1x128xf32>
    %248 = vector.extract_strided_slice %246 {offsets = [0, 0], sizes = [1, 128], strides = [1, 1]} : vector<1x384xf32> to vector<1x128xf32>
    %249 = arith.addf %247, %248 : vector<1x128xf32>
    %250 = arith.negf %249 : vector<1x128xf32>
    %251 = math.exp %250 : vector<1x128xf32>
    %cst_78 = arith.constant 1.000000e+00 : f32
    %252 = vector.broadcast %cst_78 : f32 to vector<1x128xf32>
    %253 = arith.addf %252, %251 : vector<1x128xf32>
    %254 = arith.divf %252, %253 : vector<1x128xf32>
    %255 = vector.extract_strided_slice %241 {offsets = [0, 128], sizes = [1, 128], strides = [1, 1]} : vector<1x384xf32> to vector<1x128xf32>
    %256 = vector.extract_strided_slice %246 {offsets = [0, 128], sizes = [1, 128], strides = [1, 1]} : vector<1x384xf32> to vector<1x128xf32>
    %257 = arith.addf %255, %256 : vector<1x128xf32>
    %258 = arith.negf %257 : vector<1x128xf32>
    %259 = math.exp %258 : vector<1x128xf32>
    %cst_79 = arith.constant 1.000000e+00 : f32
    %260 = vector.broadcast %cst_79 : f32 to vector<1x128xf32>
    %261 = arith.addf %260, %259 : vector<1x128xf32>
    %262 = arith.divf %260, %261 : vector<1x128xf32>
    %263 = vector.extract_strided_slice %241 {offsets = [0, 256], sizes = [1, 128], strides = [1, 1]} : vector<1x384xf32> to vector<1x128xf32>
    %264 = vector.extract_strided_slice %246 {offsets = [0, 256], sizes = [1, 128], strides = [1, 1]} : vector<1x384xf32> to vector<1x128xf32>
    %265 = arith.mulf %254, %264 : vector<1x128xf32>
    %266 = arith.addf %263, %265 : vector<1x128xf32>
    %267 = math.tanh %266 : vector<1x128xf32>
    %268 = arith.subf %237, %267 : vector<1x128xf32>
    %269 = arith.mulf %262, %268 : vector<1x128xf32>
    %270 = arith.addf %267, %269 : vector<1x128xf32>
    %271 = arith.index_cast %c7_i32 : i32 to index
    %c0_80 = arith.constant 0 : index
    %272 = vector.load %arg6[%271, %c0_80] : memref<8x128xf32, #tpu.memory_space<vmem>>, vector<1x128xf32>
    tpu.vector_store %arg6[%271, %c0_80], %270 {strides = array<i32>} : memref<8x128xf32, #tpu.memory_space<vmem>>, vector<1x128xf32>,
    %c8_i32 = arith.constant 8 : i32
    return
  }
}

</mosaic_0001>

<bundles_post_ra>
// kernel: tpu_custom_call.1
= control target key start
LH: loop header
LB: loop body
LE: loop exit
PB: predicated region body
PF: predicated region fallthrough
CT: control target
= control target key end

     0   :  { %11 = vsyncpa [#allocation4], 0  ;;  %s4000_s0 = inlined_call_operand.hbm [shape: f32[8,128], index: 0, kind: input, shape index: {}]   ;;  %s4001_s1 = inlined_call_operand.hbm [shape: f32[1,128], index: 1, kind: input, shape index: {}]   ;;  %s4002_s2 = inlined_call_operand.hbm [shape: bf16[128,384], index: 2, kind: input, shape index: {}]   ;;  %s4003_s3 = inlined_call_operand.hbm [shape: f32[1,384], index: 3, kind: input, shape index: {}]   ;;  %s4004_s4 = inlined_call_operand.hbm [shape: bf16[128,384], index: 4, kind: input, shape index: {}]   ;;  %s4005_s5 = inlined_call_operand.vmem [shape: f32[1,384], index: 5, kind: input, shape index: {}]   ;;  %s4006_s6 = inlined_call_operand.hbm [shape: f32[8,128], index: 6, kind: output, shape index: {}]  }
   0x1   :  { %12 = vsyncpa [#allocation7], 0 }
   0x2   :  { %13 = vsyncpa [#allocation10], 0  ;;  %s31_s23 = sshll.u32 %s4001_s1, 4  ;;  %s32_s23 = int_to_ptr.hbm [resolvable:$true] %s31_s23 }
   0x3   :  { %14 = vsyncpa [#allocation5], 0  ;;  %s3759_s24 = smov [#allocation6]   ;;  %s55_s28 = sshll.u32 %s4003_s3, 4  ;;  %s56_s28 = int_to_ptr.hbm [resolvable:$true] %s55_s28 }
   0x4   :  { %s33_s25 = sshll.u32 %s3759_s24, 4  ;;  %s3760_s29 = smov [#allocation9]   ;;  %s34_s25 = int_to_ptr.vmem [resolvable:$true] %s33_s25 }
   0x5   :  { %36 = dma.hbm_to_vmem [thread:$0]  %s32_s23, 16, %s34_s25, [#allocation7]  }
   0x6   :  { %s57_s30 = sshll.u32 %s3760_s29, 4  ;;  %s20_s9 = sshll.u32 %s4000_s0, 4  ;;  %s58_s30 = int_to_ptr.vmem [resolvable:$true] %s57_s30  ;;  %s21_s9 = int_to_ptr.hbm [resolvable:$true] %s20_s9 }
   0x7   :  { %60 = dma.hbm_to_vmem [thread:$0]  %s56_s28, 48, %s58_s30, [#allocation10]  }
   0x8   :  { %s41_s11 = sshll.u32 %s4002_s2, 4  ;;  %s3761_s12 = smov [#allocation3]   ;;  %s42_s11 = int_to_ptr.hbm [resolvable:$true] %s41_s11 }
   0x9   :  { %s22_s13 = sshll.u32 %s3761_s12, 4  ;;  %s3762_s3 = smov [#allocation8]   ;;  %s23_s13 = int_to_ptr.vmem [resolvable:$true] %s22_s13 }
   0xa   :  { %25 = dma.hbm_to_vmem [thread:$0]  %s21_s9, 128, %s23_s13, [#allocation4]  }
   0xb   :  { %s43_s14 = sshll.u32 %s3762_s3, 4  ;;  %s3763_s15 = smov 192   ;;  %s44_s14 = int_to_ptr.vmem [resolvable:$true] %s43_s14 }
   0xc   :  { %s3764_s16 = smov 12   ;;  %s65_s18 = sshll.u32 %s4004_s4, 4  ;;  %s66_s18 = int_to_ptr.hbm [resolvable:$true] %s65_s18 }
   0xd   :  { %49 = dma.hbm_to_vmem [thread:$0]  %s42_s11, 3072, %s44_s14, [#allocation7], %s3763_s15, %s3763_s15, %s3764_s16  }
   0xe   :  { %s3765_s19 = smov [#allocation11]  }
   0xf   :  { %s67_s20 = sshll.u32 %s3765_s19, 4  ;;  %s68_s20 = int_to_ptr.vmem [resolvable:$true] %s67_s20 }
  0x10   :  { %73 = dma.hbm_to_vmem [thread:$0]  %s66_s18, 3072, %s68_s20, [#allocation10], %s3763_s15, %s3763_s15, %s3764_s16  }
  0x11   :  { %3751 = dma.done.wait [#allocation4], 128  }
  0x12   :  { %3752 = vsyncadd [#allocation4], 4294967168 }
  0x13   :  { %3753 = dma.done.wait [#allocation7], 3088  }
  0x14   :  { %3754 = vsyncadd [#allocation7], 4294964208 }
  0x15   :  { %3755 = dma.done.wait [#allocation10], 3120  }
  0x16   :  { %3756 = vsyncadd [#allocation10], 4294964176  ;;  %v2509_v0 = vld [vmem:[#allocation8 + $0xa8] sm:$0xf]  ;;  %v3325_v1 = vld [vmem:[#allocation8 + $0xb0] sm:$0xf0] }
  0x17   :  { %v3324_v2 = vld [vmem:[#allocation8 + $0xac] sm:$0xf]  ;;  %v2510_v3 = vor.u32 %v3325_v1, %v2509_v0  ;;  %v2511_v4 = vld [vmem:[#allocation8 + $0xb4] sm:$0xf0]  ;;  %v2517_v5 = vld [vmem:[#allocation8 + $0xb0] sm:$0xf] }
  0x18   :  { %v3326_v6 = vld [vmem:[#allocation8 + $0xb8] sm:$0xf0]  ;;  %v2514_v7 = vor.u32 %v3324_v2, %v2511_v4  ;;  %v2605_v9 = vld [vmem:[#allocation11 + $0xa8] sm:$0xf]  ;;  %v3349_v10 = vld [vmem:[#allocation11 + $0xb0] sm:$0xf0] }
  0x19   :  { %v2518_v8 = vor.u32 %v3326_v6, %v2517_v5  ;;  %v2497_v11 = vld [vmem:[#allocation8 + $0x90] sm:$0xf]  ;;  %266 = vmatpush.bf16.msra.mxu0 %v2510_v3  ;;  %v2606_v12 = vor.u32 %v3349_v10, %v2605_v9  ;;  %v3322_v13 = vld [vmem:[#allocation8 + $0x98] sm:$0xf0]  ;;  %v3321_v14 = vld [vmem:[#allocation8 + $0x94] sm:$0xf] }
  0x1a   :  { %v2499_v15 = vld [vmem:[#allocation8 + $0x9c] sm:$0xf0]  ;;  %279 = vmatpush.bf16.msra.mxu1 %v2514_v7  ;;  %v2498_v16 = vor.u32 %v3322_v13, %v2497_v11  ;;  %v2505_v18 = vld [vmem:[#allocation8 + $0x98] sm:$0xf]  ;;  %v3323_v19 = vld [vmem:[#allocation8 + $0xa0] sm:$0xf0] }
  0x1b   :  { %292 = vmatpush.bf16.msra.mxu2 %v2518_v8  ;;  %v2502_v17 = vor.u32 %v3321_v14, %v2499_v15  ;;  %v2593_v20 = vld [vmem:[#allocation11 + $0x90] sm:$0xf]  ;;  %479 = vmatpush.bf16.msra.mxu3 %v2606_v12  ;;  %v2506_v21 = vor.u32 %v3323_v19, %v2505_v18  ;;  %v3346_v22 = vld [vmem:[#allocation11 + $0x98] sm:$0xf0]  ;;  %v2485_v23 = vld [vmem:[#allocation8 + $0x78] sm:$0xf] }
  0x1c   :  { %v3319_v24 = vld [vmem:[#allocation8 + $0x80] sm:$0xf0]  ;;  %v2594_v25 = vor.u32 %v3346_v22, %v2593_v20  ;;  %v3318_v26 = vld [vmem:[#allocation8 + $0x7c] sm:$0xf]  ;;  %v2487_v27 = vld [vmem:[#allocation8 + $0x84] sm:$0xf0] }
  0x1d   :  { %v2493_v28 = vld [vmem:[#allocation8 + $0x80] sm:$0xf]  ;;  %267 = vmatpush.bf16.msra.mxu0 %v2498_v16  ;;  %v2486_v29 = vor.u32 %v3319_v24, %v2485_v23  ;;  %v3320_v30 = vld [vmem:[#allocation8 + $0x88] sm:$0xf0]  ;;  %v2581_v31 = vld [vmem:[#allocation11 + $0x78] sm:$0xf]  ;;  %v2490_v33 = vor.u32 %v3318_v26, %v2487_v27 }
  0x1e   :  { %v3343_v32 = vld [vmem:[#allocation11 + $0x80] sm:$0xf0]  ;;  %280 = vmatpush.bf16.msra.mxu1 %v2502_v17  ;;  %v2494_v34 = vor.u32 %v3320_v30, %v2493_v28  ;;  %v2473_v35 = vld [vmem:[#allocation8 + $0x60] sm:$0xf]  ;;  %v3316_v36 = vld [vmem:[#allocation8 + $0x68] sm:$0xf0] }
  0x1f   :  { %293 = vmatpush.bf16.msra.mxu2 %v2506_v21  ;;  %v3315_v37 = vld [vmem:[#allocation8 + $0x64] sm:$0xf]  ;;  %480 = vmatpush.bf16.msra.mxu3 %v2594_v25  ;;  %v2582_v38 = vor.u32 %v3343_v32, %v2581_v31  ;;  %v2475_v39 = vld [vmem:[#allocation8 + $0x6c] sm:$0xf0]  ;;  %v2481_v40 = vld [vmem:[#allocation8 + $0x68] sm:$0xf]  ;;  %v2474_v44 = vor.u32 %v3316_v36, %v2473_v35 }
  0x20   :  { %v3317_v41 = vld [vmem:[#allocation8 + $0x70] sm:$0xf0]  ;;  %v2569_v42 = vld [vmem:[#allocation11 + $0x60] sm:$0xf]  ;;  %v3340_v43 = vld [vmem:[#allocation11 + $0x68] sm:$0xf0]  ;;  %v2478_v45 = vor.u32 %v3315_v37, %v2475_v39 }
  0x21   :  { %268 = vmatpush.bf16.msra.mxu0 %v2486_v29  ;;  %v2482_v46 = vor.u32 %v3317_v41, %v2481_v40  ;;  %v2461_v47 = vld [vmem:[#allocation8 + $0x48] sm:$0xf]  ;;  %v3313_v48 = vld [vmem:[#allocation8 + $0x50] sm:$0xf0]  ;;  %v3312_v49 = vld [vmem:[#allocation8 + $0x4c] sm:$0xf]  ;;  %v2570_v50 = vor.u32 %v3340_v43, %v2569_v42 }
  0x22   :  { %281 = vmatpush.bf16.msra.mxu1 %v2490_v33  ;;  %v2463_v51 = vld [vmem:[#allocation8 + $0x54] sm:$0xf0]  ;;  %v2469_v52 = vld [vmem:[#allocation8 + $0x50] sm:$0xf]  ;;  %v3314_v53 = vld [vmem:[#allocation8 + $0x58] sm:$0xf0]  ;;  %v2462_v56 = vor.u32 %v3313_v48, %v2461_v47 }
  0x23   :  { %294 = vmatpush.bf16.msra.mxu2 %v2494_v34  ;;  %481 = vmatpush.bf16.msra.mxu3 %v2582_v38  ;;  %v2557_v54 = vld [vmem:[#allocation11 + $0x48] sm:$0xf]  ;;  %v3337_v55 = vld [vmem:[#allocation11 + $0x50] sm:$0xf0]  ;;  %v2466_v57 = vor.u32 %v3312_v49, %v2463_v51  ;;  %v2470_v58 = vor.u32 %v3314_v53, %v2469_v52  ;;  %v2449_v59 = vld [vmem:[#allocation8 + $0x30] sm:$0xf] }
  0x24   :  { %v3310_v60 = vld [vmem:[#allocation8 + $0x38] sm:$0xf0]  ;;  %v3309_v61 = vld [vmem:[#allocation8 + $0x34] sm:$0xf]  ;;  %v2558_v62 = vor.u32 %v3337_v55, %v2557_v54  ;;  %v2451_v63 = vld [vmem:[#allocation8 + $0x3c] sm:$0xf0] }
  0x25   :  { %269 = vmatpush.bf16.msra.mxu0 %v2474_v44  ;;  %v2457_v0 = vld [vmem:[#allocation8 + $0x38] sm:$0xf]  ;;  %v3311_v1 = vld [vmem:[#allocation8 + $0x40] sm:$0xf0]  ;;  %v2545_v2 = vld [vmem:[#allocation11 + $0x30] sm:$0xf]  ;;  %v2450_v4 = vor.u32 %v3310_v60, %v2449_v59  ;;  %v2454_v5 = vor.u32 %v3309_v61, %v2451_v63 }
  0x26   :  { %282 = vmatpush.bf16.msra.mxu1 %v2478_v45  ;;  %v3334_v3 = vld [vmem:[#allocation11 + $0x38] sm:$0xf0]  ;;  %v2458_v6 = vor.u32 %v3311_v1, %v2457_v0  ;;  %v2437_v7 = vld [vmem:[#allocation8 + $0x18] sm:$0xf]  ;;  %v3307_v8 = vld [vmem:[#allocation8 + $0x20] sm:$0xf0] }
  0x27   :  { %295 = vmatpush.bf16.msra.mxu2 %v2482_v46  ;;  %482 = vmatpush.bf16.msra.mxu3 %v2570_v50  ;;  %v3306_v9 = vld [vmem:[#allocation8 + $0x1c] sm:$0xf]  ;;  %v2546_v10 = vor.u32 %v3334_v3, %v2545_v2  ;;  %v2439_v11 = vld [vmem:[#allocation8 + $0x24] sm:$0xf0]  ;;  %v2445_v12 = vld [vmem:[#allocation8 + $0x20] sm:$0xf]  ;;  %v2438_v16 = vor.u32 %v3307_v8, %v2437_v7 }
  0x28   :  { %v3308_v13 = vld [vmem:[#allocation8 + $0x28] sm:$0xf0]  ;;  %v2533_v14 = vld [vmem:[#allocation11 + $0x18] sm:$0xf]  ;;  %v3331_v15 = vld [vmem:[#allocation11 + $0x20] sm:$0xf0]  ;;  %v2442_v18 = vor.u32 %v3306_v9, %v2439_v11 }
  0x29   :  { %270 = vmatpush.bf16.msra.mxu0 %v2462_v56  ;;  %v2425_v17 = vld [vmem:[#allocation8] sm:$0xf]  ;;  %v2446_v19 = vor.u32 %v3308_v13, %v2445_v12  ;;  %v3304_v20 = vld [vmem:[#allocation8 + $0x8] sm:$0xf0]  ;;  %v3303_v21 = vld [vmem:[#allocation8 + $0x4] sm:$0xf]  ;;  %v2534_v23 = vor.u32 %v3331_v15, %v2533_v14 }
  0x2a   :  { %283 = vmatpush.bf16.msra.mxu1 %v2466_v57  ;;  %v2427_v22 = vld [vmem:[#allocation8 + $0xc] sm:$0xf0]  ;;  %v2433_v24 = vld [vmem:[#allocation8 + $0x8] sm:$0xf]  ;;  %v3305_v25 = vld [vmem:[#allocation8 + $0x10] sm:$0xf0]  ;;  %v2426_v30 = vor.u32 %v3304_v20, %v2425_v17 }
  0x2b   :  { %296 = vmatpush.bf16.msra.mxu2 %v2470_v58  ;;  %483 = vmatpush.bf16.msra.mxu3 %v2558_v62  ;;  %v3348_v26 = vld [vmem:[#allocation11 + $0xac] sm:$0xf]  ;;  %v2607_v27 = vld [vmem:[#allocation11 + $0xb4] sm:$0xf0]  ;;  %v2521_v28 = vld [vmem:[#allocation11] sm:$0xf]  ;;  %v2430_v34 = vor.u32 %v3303_v21, %v2427_v22  ;;  %v2434_v35 = vor.u32 %v3305_v25, %v2433_v24 }
  0x2c   :  { %v3328_v29 = vld [vmem:[#allocation11 + $0x8] sm:$0xf0]  ;;  %v96_v31 = vld [vmem:[#allocation3] sm:$0xff]  ;;  %v3350_v33 = vld [vmem:[#allocation11 + $0xb8] sm:$0xf0]  ;;  %v2610_v36 = vor.u32 %v3348_v26, %v2607_v27  ;;  %s2411_s13 = sshll.u32 %s4006_s6, 4  ;;  %s2412_s13 = int_to_ptr.hbm [resolvable:$true] %s2411_s13 }
  0x2d   :  { %271 = vmatpush.bf16.msra.mxu0 %v2450_v4  ;;  %v2613_v32 = vld [vmem:[#allocation11 + $0xb0] sm:$0xf]  ;;  %v2522_v37 = vor.u32 %v3328_v29, %v2521_v28  ;;  %v3817_v38 = vld [vmem:[#allocation6] sm:$0x1]  ;;  %v97_v39 = vpack.c.bf16 %v96_v31, %v96_v31  ;;  %v3345_v40 = vld [vmem:[#allocation11 + $0x94] sm:$0xf] }
  0x2e   :  { %284 = vmatpush.bf16.msra.mxu1 %v2454_v5  ;;  %v2595_v41 = vld [vmem:[#allocation11 + $0x9c] sm:$0xf0]  ;;  %v2614_v42 = vor.u32 %v3350_v33, %v2613_v32  ;;  %v2601_v43 = vld [vmem:[#allocation11 + $0x98] sm:$0xf]  ;;  %v3347_v44 = vld [vmem:[#allocation11 + $0xa0] sm:$0xf0]  ;;  %v310_v45 = vpack.c.bf16 %v3817_v38, %v3817_v38 }
  0x2f   :  { %297 = vmatpush.bf16.msra.mxu2 %v2458_v6  ;;  %484 = vmatpush.bf16.msra.mxu3 %v2546_v10  ;;  %v2598_v46 = vor.u32 %v3345_v40, %v2595_v41  ;;  %v3342_v47 = vld [vmem:[#allocation11 + $0x7c] sm:$0xf]  ;;  %v2583_v48 = vld [vmem:[#allocation11 + $0x84] sm:$0xf0]  ;;  %v2602_v49 = vor.u32 %v3347_v44, %v2601_v43  ;;  %v2589_v50 = vld [vmem:[#allocation11 + $0x80] sm:$0xf] }
  0x30   :  { %v3344_v51 = vld [vmem:[#allocation11 + $0x88] sm:$0xf0]  ;;  %v2586_v52 = vor.u32 %v3342_v47, %v2583_v48  ;;  %v3339_v53 = vld [vmem:[#allocation11 + $0x64] sm:$0xf]  ;;  %v2571_v54 = vld [vmem:[#allocation11 + $0x6c] sm:$0xf0] }
  0x31   :  { %272 = vmatpush.bf16.msra.mxu0 %v2438_v16  ;;  %v2590_v55 = vor.u32 %v3344_v51, %v2589_v50  ;;  %v2577_v56 = vld [vmem:[#allocation11 + $0x68] sm:$0xf]  ;;  %v3341_v57 = vld [vmem:[#allocation11 + $0x70] sm:$0xf0]  ;;  %v2574_v58 = vor.u32 %v3339_v53, %v2571_v54  ;;  %v3336_v59 = vld [vmem:[#allocation11 + $0x4c] sm:$0xf] }
  0x32   :  { %285 = vmatpush.bf16.msra.mxu1 %v2442_v18  ;;  %v2559_v60 = vld [vmem:[#allocation11 + $0x54] sm:$0xf0]  ;;  %v2578_v61 = vor.u32 %v3341_v57, %v2577_v56  ;;  %v2565_v62 = vld [vmem:[#allocation11 + $0x50] sm:$0xf]  ;;  %v3338_v63 = vld [vmem:[#allocation11 + $0x58] sm:$0xf0] }
  0x33   :  { %298 = vmatpush.bf16.msra.mxu2 %v2446_v19  ;;  %485 = vmatpush.bf16.msra.mxu3 %v2534_v23  ;;  %v2562_v0 = vor.u32 %v3336_v59, %v2559_v60  ;;  %v3333_v1 = vld [vmem:[#allocation11 + $0x34] sm:$0xf]  ;;  %v2547_v2 = vld [vmem:[#allocation11 + $0x3c] sm:$0xf0]  ;;  %v2566_v3 = vor.u32 %v3338_v63, %v2565_v62  ;;  %v2553_v4 = vld [vmem:[#allocation11 + $0x38] sm:$0xf] }
  0x34   :  { %v3335_v5 = vld [vmem:[#allocation11 + $0x40] sm:$0xf0]  ;;  %v2550_v6 = vor.u32 %v3333_v1, %v2547_v2  ;;  %v3330_v7 = vld [vmem:[#allocation11 + $0x1c] sm:$0xf]  ;;  %v2535_v8 = vld [vmem:[#allocation11 + $0x24] sm:$0xf0] }
  0x35   :  { %273 = vmatpush.bf16.msra.mxu0 %v2426_v30  ;;  %v2554_v9 = vor.u32 %v3335_v5, %v2553_v4  ;;  %v2541_v10 = vld [vmem:[#allocation11 + $0x20] sm:$0xf]  ;;  %v3332_v11 = vld [vmem:[#allocation11 + $0x28] sm:$0xf0]  ;;  %v2538_v12 = vor.u32 %v3330_v7, %v2535_v8  ;;  %v3327_v13 = vld [vmem:[#allocation11 + $0x4] sm:$0xf] }
  0x36   :  { %286 = vmatpush.bf16.msra.mxu1 %v2430_v34  ;;  %v2523_v14 = vld [vmem:[#allocation11 + $0xc] sm:$0xf0]  ;;  %v2542_v15 = vor.u32 %v3332_v11, %v2541_v10  ;;  %v2529_v16 = vld [vmem:[#allocation11 + $0x8] sm:$0xf]  ;;  %v3329_v17 = vld [vmem:[#allocation11 + $0x10] sm:$0xf0] }
  0x37   :  { %299 = vmatpush.bf16.msra.mxu2 %v2434_v35  ;;  %486 = vmatpush.bf16.msra.mxu3 %v2522_v37  ;;  %v2526_v18 = vor.u32 %v3327_v13, %v2523_v14  ;;  %v2530_v19 = vor.u32 %v3329_v17, %v2529_v16  ;;  %v130_v20 = vld [vmem:[#allocation9] sm:$0x7]  ;;  %v2703_v27 = vld [vmem:[#allocation11 + $0xa8] sm:$0xf]  ;;  %v3373_v28 = vld [vmem:[#allocation11 + $0xb0] sm:$0xf0] }
  0x38   :  { %274 = vmatmul.bf16.vlgmr.msra.gmra.mxu0 %v97_v39  ;;  %v132_v21 = vperm.slane %v130_v20, 0  ;;  %v133_v22 = vperm.slane %v130_v20, 1  ;;  %v134_v29 = vperm.slane %v130_v20, 2  ;;  %v2704_v30 = vor.u32 %v3373_v28, %v2703_v27  ;;  %v3372_v31 = vld [vmem:[#allocation11 + $0xac] sm:$0xf] }
  0x39   :  { %492 = vmatpush.bf16.msrb.mxu0 %v2610_v36  ;;  %287 = vmatmul.bf16.vlgmr.msra.gmra.mxu1 %v97_v39  ;;  %v2705_v32 = vld [vmem:[#allocation11 + $0xb4] sm:$0xf0]  ;;  %v2711_v34 = vld [vmem:[#allocation11 + $0xb0] sm:$0xf]  ;;  %v3374_v35 = vld [vmem:[#allocation11 + $0xb8] sm:$0xf0] }
  0x3a   :  { %505 = vmatpush.bf16.msrb.mxu1 %v2614_v42  ;;  %300 = vmatmul.bf16.vlgmr.msra.gmra.mxu2 %v97_v39  ;;  %v2708_v33 = vor.u32 %v3372_v31, %v2705_v32  ;;  %v3824_v36 = vld [vmem:[%s4005_s5] sm:$0x7]  ;;  %v2712_v37 = vor.u32 %v3374_v35, %v2711_v34  ;;  %v2691_v40 = vld [vmem:[#allocation11 + $0x90] sm:$0xf]  ;;  %v3369_v42 = vld [vmem:[#allocation11 + $0x94] sm:$0xf] }
  0x3b   :  { %487 = vmatmul.bf16.vlgmr.msra.gmra.mxu3 %v310_v45  ;;  %741 = vmatpush.bf16.msrb.mxu2 %v2704_v30  ;;  %v3370_v41 = vld [vmem:[#allocation11 + $0x98] sm:$0xf0]  ;;  %v2693_v47 = vld [vmem:[#allocation11 + $0x9c] sm:$0xf0]  ;;  %v2699_v48 = vld [vmem:[#allocation11 + $0x98] sm:$0xf] }
  0x3c   :  { %754 = vmatpush.bf16.msrb.mxu3 %v2708_v33  ;;  %v2696_v51 = vor.u32 %v3369_v42, %v2693_v47  ;;  %v473_v53 = vperm.slane %v3824_v36, 0  ;;  %v2679_v54 = vld [vmem:[#allocation11 + $0x78] sm:$0xf]  ;;  %v3366_v56 = vld [vmem:[#allocation11 + $0x7c] sm:$0xf]  ;;  %v474_v32 = vperm.slane %v3824_v36, 1 }
  0x3d   :  { %493 = vmatpush.bf16.msrb.mxu0 %v2598_v46  ;;  %v2692_v46 = vor.u32 %v3370_v41, %v2691_v40  ;;  %v2687_v59 = vld [vmem:[#allocation11 + $0x80] sm:$0xf]  ;;  %v3364_v2 = vld [vmem:[#allocation11 + $0x68] sm:$0xf0]  ;;  %v2675_v7 = vld [vmem:[#allocation11 + $0x68] sm:$0xf] }
  0x3e   :  { %506 = vmatpush.bf16.msrb.mxu1 %v2602_v49  ;;  %v3371_v49 = vld [vmem:[#allocation11 + $0xa0] sm:$0xf0]  ;;  %v2667_v1 = vld [vmem:[#allocation11 + $0x60] sm:$0xf]  ;;  %v3365_v8 = vld [vmem:[#allocation11 + $0x70] sm:$0xf0] }
  0x3f   :  { %742 = vmatpush.bf16.msrb.mxu2 %v2692_v46  ;;  %v2668_v5 = vor.u32 %v3364_v2, %v2667_v1  ;;  %v2676_v11 = vor.u32 %v3365_v8, %v2675_v7  ;;  %v2655_v13 = vld [vmem:[#allocation11 + $0x48] sm:$0xf]  ;;  %v3361_v14 = vld [vmem:[#allocation11 + $0x50] sm:$0xf0]  ;;  %v2645_v27 = vld [vmem:[#allocation11 + $0x3c] sm:$0xf0] }
  0x40   :  { %755 = vmatpush.bf16.msrb.mxu3 %v2696_v51  ;;  %v2656_v17 = vor.u32 %v3361_v14, %v2655_v13  ;;  %v2651_v28 = vld [vmem:[#allocation11 + $0x38] sm:$0xf]  ;;  %v3355_v34 = vld [vmem:[#allocation11 + $0x20] sm:$0xf0]  ;;  %v3354_v35 = vld [vmem:[#allocation11 + $0x1c] sm:$0xf] }
  0x41   :  { %494 = vmatpush.bf16.msrb.mxu0 %v2586_v52  ;;  %v2700_v52 = vor.u32 %v3371_v49, %v2699_v48  ;;  %v2631_v33 = vld [vmem:[#allocation11 + $0x18] sm:$0xf]  ;;  %v2633_v40 = vld [vmem:[#allocation11 + $0x24] sm:$0xf0]  ;;  %v2639_v41 = vld [vmem:[#allocation11 + $0x20] sm:$0xf] }
  0x42   :  { %507 = vmatpush.bf16.msrb.mxu1 %v2590_v55  ;;  %v3367_v55 = vld [vmem:[#allocation11 + $0x80] sm:$0xf0]  ;;  %v3356_v42 = vld [vmem:[#allocation11 + $0x28] sm:$0xf0]  ;;  %v2619_v46 = vld [vmem:[#allocation11] sm:$0xf] }
  0x43   :  { %v2680_v57 = vor.u32 %v3367_v55, %v2679_v54  ;;  %v3352_v47 = vld [vmem:[#allocation11 + $0x8] sm:$0xf0]  ;;  %v2621_v51 = vld [vmem:[#allocation11 + $0xc] sm:$0xf0]  ;;  %v475_v1 = vperm.slane %v3824_v36, 2 }
  0x44   :  { %v2620_v49 = vor.u32 %v3352_v47, %v2619_v46  ;;  %v3395_v46 = vld [vmem:[#allocation11 + $0xa0] sm:$0xf0] }
  0x45   :  { %495 = vmatpush.bf16.msrb.mxu0 %v2574_v58  ;;  %v2681_v58 = vld [vmem:[#allocation11 + $0x84] sm:$0xf0]  ;;  %743 = vmatpush.bf16.msrb.mxu2 %v2680_v57 }
  0x46   :  { %508 = vmatpush.bf16.msrb.mxu1 %v2578_v61  ;;  %v2684_v60 = vor.u32 %v3366_v56, %v2681_v58  ;;  %v3368_v61 = vld [vmem:[#allocation11 + $0x88] sm:$0xf0]  ;;  %v3353_v56 = vld [vmem:[#allocation11 + $0x10] sm:$0xf0] }
  0x47   :  { %v2688_v63 = vor.u32 %v3368_v61, %v2687_v59 }
  0x48   :  { %756 = vmatpush.bf16.msrb.mxu3 %v2684_v60 }
  0x49   :  { %496 = vmatpush.bf16.msrb.mxu0 %v2562_v0  ;;  %744 = vmatpush.bf16.msrb.mxu2 %v2668_v5 }
  0x4a   :  { %509 = vmatpush.bf16.msrb.mxu1 %v2566_v3  ;;  %v3363_v3 = vld [vmem:[#allocation11 + $0x64] sm:$0xf] }
  0x4d   :  { %497 = vmatpush.bf16.msrb.mxu0 %v2550_v6  ;;  %v2669_v6 = vld [vmem:[#allocation11 + $0x6c] sm:$0xf0]  ;;  %745 = vmatpush.bf16.msrb.mxu2 %v2656_v17 }
  0x4e   :  { %510 = vmatpush.bf16.msrb.mxu1 %v2554_v9  ;;  %v2672_v10 = vor.u32 %v3363_v3, %v2669_v6 }
  0x50   :  { %757 = vmatpush.bf16.msrb.mxu3 %v2672_v10 }
  0x51   :  { %498 = vmatpush.bf16.msrb.mxu0 %v2538_v12 }
  0x52   :  { %511 = vmatpush.bf16.msrb.mxu1 %v2542_v15  ;;  %v3360_v15 = vld [vmem:[#allocation11 + $0x4c] sm:$0xf] }
  0x55   :  { %499 = vmatpush.bf16.msrb.mxu0 %v2526_v18  ;;  %v2657_v18 = vld [vmem:[#allocation11 + $0x54] sm:$0xf0] }
  0x56   :  { %512 = vmatpush.bf16.msrb.mxu1 %v2530_v19  ;;  %v2663_v19 = vld [vmem:[#allocation11 + $0x50] sm:$0xf]  ;;  %v2660_v20 = vor.u32 %v3360_v15, %v2657_v18 }
  0x58   :  { %500 = vmatmul.bf16.vlgmr.msrb.gmra.mxu0 %v310_v45  ;;  %758 = vmatpush.bf16.msrb.mxu3 %v2660_v20 }
  0x59   :  { %513 = vmatmul.bf16.vlgmr.msrb.gmra.mxu1 %v310_v45  ;;  %767 = vmatpush.bf16.msra.mxu0 %v2712_v37 }
  0x5d   :  { %768 = vmatpush.bf16.msra.mxu0 %v2700_v52  ;;  %v2627_v52 = vld [vmem:[#allocation11 + $0x8] sm:$0xf] }
  0x5e   :  { %v2628_v58 = vor.u32 %v3353_v56, %v2627_v52  ;;  %v2777_v52 = vld [vmem:[#allocation11 + $0x78] sm:$0xf]  ;;  %v2779_v56 = vld [vmem:[#allocation11 + $0x84] sm:$0xf0] }
  0x61   :  { %769 = vmatpush.bf16.msra.mxu0 %v2688_v63 }
  0x65   :  { %770 = vmatpush.bf16.msra.mxu0 %v2676_v11 }
  0xb5   :  { %v275_v23 = vpop.f32.mrf.mxu0 }
  0xb6   :  { %v276_v24 = vadd.f32 %v275_v23, %v132_v21  ;;  %v288_v25 = vpop.f32.mrf.mxu1  ;;  %v3362_v21 = vld [vmem:[#allocation11 + $0x58] sm:$0xf0]  ;;  %v2643_v23 = vld [vmem:[#allocation11 + $0x30] sm:$0xf] }
  0xb7   :  { %v289_v26 = vadd.f32 %v288_v25, %v133_v22  ;;  %v2664_v22 = vor.u32 %v3362_v21, %v2663_v19  ;;  %v3357_v25 = vld [vmem:[#allocation11 + $0x34] sm:$0xf] }
  0xb8   :  { %305 = vst [vmem:[#allocation2] sm:$0xff] %v276_v24  ;;  %v3358_v24 = vld [vmem:[#allocation11 + $0x38] sm:$0xf0]  ;;  %v2648_v30 = vor.u32 %v3357_v25, %v2645_v27 }
  0xb9   :  { %306 = vst [vmem:[#allocation2 + $0x8] sm:$0xff] %v289_v26  ;;  %771 = vmatpush.bf16.msra.mxu0 %v2664_v22  ;;  %v2644_v26 = vor.u32 %v3358_v24, %v2643_v23 }
  0xba   :  { %759 = vmatpush.bf16.msrb.mxu3 %v2648_v30  ;;  %v2801_v30 = vld [vmem:[#allocation11 + $0xa8] sm:$0xf] }
  0xbb   :  { %746 = vmatpush.bf16.msrb.mxu2 %v2644_v26 }
  0xbd   :  { %v301_v39 = vpop.f32.mrf.mxu2  ;;  %v277_v44 = vpop.f32.mrf.mxu0 }
  0xbe   :  { %v302_v43 = vadd.f32 %v301_v39, %v134_v29  ;;  %v488_v45 = vpop.f32.mrf.mxu3  ;;  %v290_v50 = vpop.f32.mrf.mxu1  ;;  %v3359_v29 = vld [vmem:[#allocation11 + $0x40] sm:$0xf0]  ;;  %v2632_v39 = vor.u32 %v3355_v34, %v2631_v33  ;;  %v2636_v44 = vor.u32 %v3354_v35, %v2633_v40  ;;  %v2803_v34 = vld [vmem:[#allocation11 + $0xb4] sm:$0xf0]  ;;  %v3398_v35 = vld [vmem:[#allocation11 + $0xb8] sm:$0xf0] }
  0xbf   :  { %v489_v62 = vadd.f32 %v488_v45, %v473_v53  ;;  %v2652_v31 = vor.u32 %v3359_v29, %v2651_v28  ;;  %v2640_v45 = vor.u32 %v3356_v42, %v2639_v41  ;;  %v3351_v50 = vld [vmem:[#allocation11 + $0x4] sm:$0xf]  ;;  %v2789_v40 = vld [vmem:[#allocation11 + $0x90] sm:$0xf]  ;;  %v3394_v41 = vld [vmem:[#allocation11 + $0x98] sm:$0xf0] }
  0xc0   :  { %307 = vst [vmem:[#allocation2 + $0x10] sm:$0xff] %v302_v43  ;;  %747 = vmatpush.bf16.msrb.mxu2 %v2632_v39  ;;  %760 = vmatpush.bf16.msrb.mxu3 %v2636_v44  ;;  %v2624_v57 = vor.u32 %v3351_v50, %v2621_v51  ;;  %v3393_v42 = vld [vmem:[#allocation11 + $0x94] sm:$0xf]  ;;  %v2791_v44 = vld [vmem:[#allocation11 + $0x9c] sm:$0xf0] }
  0xc1   :  { %772 = vmatpush.bf16.msra.mxu0 %v2652_v31  ;;  %v3397_v31 = vld [vmem:[#allocation11 + $0xb0] sm:$0xf0]  ;;  %v2794_v47 = vor.u32 %v3393_v42, %v2791_v44  ;;  %v2731_v42 = vld [vmem:[#allocation11 + $0x24] sm:$0xf0]  ;;  %v3380_v44 = vld [vmem:[#allocation11 + $0x28] sm:$0xf0] }
  0xc2   :  { %v2802_v33 = vor.u32 %v3397_v31, %v2801_v30  ;;  %v2743_v30 = vld [vmem:[#allocation11 + $0x3c] sm:$0xf0] }
  0xc4   :  { %748 = vmatpush.bf16.msrb.mxu2 %v2620_v49  ;;  %761 = vmatpush.bf16.msrb.mxu3 %v2624_v57  ;;  %v3843_v49 = vld [vmem:[%s4005_s5] sm:$0x7]  ;;  %v2785_v57 = vld [vmem:[#allocation11 + $0x80] sm:$0xf] }
  0xc5   :  { %v303_v0 = vpop.f32.mrf.mxu2  ;;  %773 = vmatpush.bf16.msra.mxu0 %v2640_v45  ;;  %1003 = vmatpush.bf16.msra.mxu1 %v2802_v33  ;;  %v2797_v45 = vld [vmem:[#allocation11 + $0x98] sm:$0xf] }
  0xc6   :  { %v490_v4 = vpop.f32.mrf.mxu3  ;;  %v2749_v33 = vld [vmem:[#allocation11 + $0x38] sm:$0xf] }
  0xc7   :  { %v3827_v9 = vld [vmem:[#allocation2] ss:$8 sm:$0x7]  ;;  %v3845_v50 = vld [vmem:[#allocation2 + $0x1] ss:$8 sm:$0x7] }
  0xc8   :  { %v518_v12 = vadd.f32 %v489_v62, %v3827_v9  ;;  %v539_v54 = vrot.slane %v3827_v9, 1  ;;  %v562_v15 = vrot.slane %v3827_v9, 2 }
  0xc9   :  { %774 = vmatpush.bf16.msra.mxu0 %v2628_v58  ;;  %v3392_v58 = vld [vmem:[#allocation11 + $0x88] sm:$0xf0] }
  0xca   :  { %v2615_v16 = vmul.f32 -1.442695, %v518_v12 }
  0xcc   :  { %3527 = vpow2.f32 %v2615_v16 }
  0xd2   :  { %v3528_v37 = vpop.eup %3527 }
  0xd3   :  { %v522_v43 = vadd.f32 1.0, %v3528_v37 }
  0xd5   :  { %v501_v48 = vpop.f32.mrf.mxu0  ;;  %3529 = vrcp.f32 %v522_v43  ;;  %v534_v3 = vand.u32 2147483648, %v522_v43  ;;  %v532_v5 = vand.u32 2147483647, %v522_v43  ;;  %vm528_vm1 = vweird.f32 %v522_v43 }
  0xd6   :  { %v502_v53 = vadd.f32 %v501_v48, %v474_v32  ;;  %v514_v55 = vpop.f32.mrf.mxu1  ;;  %v3396_v32 = vld [vmem:[#allocation11 + $0xac] sm:$0xf]  ;;  %v2798_v48 = vor.u32 %v3395_v46, %v2797_v45 }
  0xd7   :  { %v515_v8 = vadd.f32 %v514_v55, %v475_v1  ;;  %v535_v11 = vor.u32 1.1754944e-38, %v534_v3  ;;  %vm533_vm3 = vcmp.eq.f32.partialorder %v532_v5, 8.507059e+37  ;;  %v2806_v37 = vor.u32 %v3396_v32, %v2803_v34  ;;  %v3388_v1 = vld [vmem:[#allocation11 + $0x68] sm:$0xf0]  ;;  %v3383_v34 = vld [vmem:[#allocation11 + $0x40] sm:$0xf0] }
  0xd8   :  { %v541_v59 = vadd.f32 %v539_v54, %v502_v53  ;;  %v3391_v53 = vld [vmem:[#allocation11 + $0x80] sm:$0xf0]  ;;  %v3390_v54 = vld [vmem:[#allocation11 + $0x7c] sm:$0xf] }
  0xd9   :  { %1016 = vmatpush.bf16.msra.mxu2 %v2806_v37  ;;  %v2778_v55 = vor.u32 %v3391_v53, %v2777_v52  ;;  %v3376_v52 = vld [vmem:[#allocation11 + $0x8] sm:$0xf0]  ;;  %v3375_v53 = vld [vmem:[#allocation11 + $0x4] sm:$0xf] }
  0xda   :  { %v2616_v60 = vmul.f32 -1.442695, %v541_v59  ;;  %v735_v59 = vperm.slane %v3843_v49, 0 }
  0xdb   :  { %v3530_v61 = vpop.eup %3529 }
  0xdc   :  { %3531 = vpow2.f32 %v2616_v60  ;;  %v524_v63 = vmul.f32 %v3530_v61, %v522_v43  ;;  %vm529_vm0 = vweird.f32 %v3530_v61  ;;  %v2790_v43 = vor.u32 %v3394_v41, %v2789_v40  ;;  %v3379_v40 = vld [vmem:[#allocation11 + $0x20] sm:$0xf0]  ;;  %v3378_v41 = vld [vmem:[#allocation11 + $0x1c] sm:$0xf] }
  0xdd   :  { %v503_v62 = vpop.f32.mrf.mxu0  ;;  %vm530_vm2 = vmor %vm528_vm1, %vm529_vm0  ;;  %1017 = vmatpush.bf16.msra.mxu2 %v2794_v47  ;;  %v736_v60 = vperm.slane %v3843_v49, 1  ;;  %v2734_v46 = vor.u32 %v3378_v41, %v2731_v42  ;;  %v2895_v41 = vld [vmem:[#allocation11 + $0x98] sm:$0xf]  ;;  %v3419_v42 = vld [vmem:[#allocation11 + $0xa0] sm:$0xf0] }
  0xde   :  { %v516_v0 = vpop.f32.mrf.mxu1  ;;  %v525_v2 = vsub.f32 1.0, %v524_v63  ;;  %1004 = vmatpush.bf16.msra.mxu1 %v2790_v43  ;;  %v2786_v62 = vor.u32 %v3392_v58, %v2785_v57  ;;  %v801_v63 = vrot.slane %v3845_v50, 1  ;;  %v2737_v43 = vld [vmem:[#allocation11 + $0x20] sm:$0xf] }
  0xdf   :  { %v2765_v0 = vld [vmem:[#allocation11 + $0x60] sm:$0xf]  ;;  %v2738_v47 = vor.u32 %v3380_v44, %v2737_v43  ;;  %v2896_v44 = vor.u32 %v3419_v42, %v2895_v41  ;;  %v3404_v41 = vld [vmem:[#allocation11 + $0x28] sm:$0xf0] }
  0xe0   :  { %v526_v4 = vmul.f32 %v3530_v61, %v525_v2  ;;  %v3387_v2 = vld [vmem:[#allocation11 + $0x64] sm:$0xf]  ;;  %v2766_v5 = vor.u32 %v3388_v1, %v2765_v0  ;;  %v2815_v42 = vld [vmem:[#allocation11] sm:$0xf] }
  0xe2   :  { %v3532_v6 = vpop.eup %3531  ;;  %v527_v10 = vadd.f32 %v3530_v61, %v526_v4  ;;  %1005 = vmatpush.bf16.msra.mxu1 %v2778_v55  ;;  %v2725_v55 = vld [vmem:[#allocation11 + $0x8] sm:$0xf] }
  0xe3   :  { %v545_v7 = vadd.f32 1.0, %v3532_v6  ;;  %v2767_v6 = vld [vmem:[#allocation11 + $0x6c] sm:$0xf0] }
  0xe4   :  { %v531_v12 = vsel %vm530_vm2, %v3530_v61, %v527_v10  ;;  %v2782_v61 = vor.u32 %v3390_v54, %v2779_v56  ;;  %v2719_v54 = vld [vmem:[#allocation11 + $0xc] sm:$0xf0]  ;;  %v3377_v56 = vld [vmem:[#allocation11 + $0x10] sm:$0xf0] }
  0xe5   :  { %3533 = vrcp.f32 %v545_v7  ;;  %v536_v13 = vsel %vm533_vm3, %v535_v11, %v531_v12  ;;  %v557_v19 = vand.u32 2147483648, %v545_v7  ;;  %v555_v21 = vand.u32 2147483647, %v545_v7 }
  0xe6   :  { %v561_v14 = vmul.f32 %v536_v13, %v515_v8  ;;  %vm551_vm5 = vweird.f32 %v545_v7  ;;  %1018 = vmatpush.bf16.msra.mxu2 %v2782_v61  ;;  %v3389_v8 = vld [vmem:[#allocation11 + $0x70] sm:$0xf0]  ;;  %v2770_v12 = vor.u32 %v3387_v2, %v2767_v6  ;;  %1006 = vmatpush.bf16.msra.mxu1 %v2766_v5  ;;  %v737_v6 = vperm.slane %v3843_v49, 2 }
  0xe7   :  { %v558_v24 = vor.u32 1.1754944e-38, %v557_v19  ;;  %vm556_vm7 = vcmp.eq.f32.partialorder %v555_v21, 8.507059e+37  ;;  %v2761_v21 = vld [vmem:[#allocation11 + $0x50] sm:$0xf] }
  0xe8   :  { %v564_v36 = vadd.f32 %v562_v15, %v561_v14 }
  0xea   :  { %3535 = vtanh.f32 %v564_v36  ;;  %1019 = vmatpush.bf16.msra.mxu2 %v2770_v12 }
  0xeb   :  { %v3534_v16 = vpop.eup %3533 }
  0xec   :  { %v547_v17 = vmul.f32 %v3534_v16, %v545_v7  ;;  %vm552_vm4 = vweird.f32 %v3534_v16  ;;  %v2773_v7 = vld [vmem:[#allocation11 + $0x68] sm:$0xf] }
  0xed   :  { %vm553_vm6 = vmor %vm551_vm5, %vm552_vm4  ;;  %v2774_v13 = vor.u32 %v3389_v8, %v2773_v7 }
  0xee   :  { %v548_v18 = vsub.f32 1.0, %v547_v17  ;;  %v3385_v17 = vld [vmem:[#allocation11 + $0x50] sm:$0xf0] }
  0xf0   :  { %v549_v20 = vmul.f32 %v3534_v16, %v548_v18  ;;  %v3536_v22 = vpop.eup %3535  ;;  %v3384_v18 = vld [vmem:[#allocation11 + $0x4c] sm:$0xf] }
  0xf1   :  { %v566_v25 = vsub.f32 %v3817_v38, %v3536_v22  ;;  %v2809_v38 = vld [vmem:[#allocation11 + $0xb0] sm:$0xf] }
  0xf2   :  { %v550_v23 = vadd.f32 %v3534_v16, %v549_v20  ;;  %v2810_v39 = vor.u32 %v3398_v35, %v2809_v38  ;;  %v2755_v20 = vld [vmem:[#allocation11 + $0x54] sm:$0xf0] }
  0xf3   :  { %v2729_v38 = vld [vmem:[#allocation11 + $0x18] sm:$0xf] }
  0xf4   :  { %v554_v26 = vsel %vm553_vm6, %v3534_v16, %v550_v23  ;;  %1029 = vmatpush.bf16.msra.mxu3 %v2810_v39  ;;  %v2753_v16 = vld [vmem:[#allocation11 + $0x48] sm:$0xf]  ;;  %v2750_v39 = vor.u32 %v3383_v34, %v2749_v33  ;;  %v2730_v45 = vor.u32 %v3379_v40, %v2729_v38  ;;  %v3422_v33 = vld [vmem:[#allocation11 + $0xb8] sm:$0xf0]  ;;  %v2887_v38 = vld [vmem:[#allocation11 + $0x90] sm:$0xf] }
  0xf5   :  { %v559_v27 = vsel %vm556_vm7, %v558_v24, %v554_v26  ;;  %v2754_v19 = vor.u32 %v3385_v17, %v2753_v16  ;;  %v824_v16 = vrot.slane %v3845_v50, 2  ;;  %v2889_v40 = vld [vmem:[#allocation11 + $0x9c] sm:$0xf0] }
  0xf6   :  { %v567_v9 = vmul.f32 %v566_v25, %v559_v27  ;;  %v2758_v25 = vor.u32 %v3384_v18, %v2755_v20  ;;  %v2741_v27 = vld [vmem:[#allocation11 + $0x30] sm:$0xf] }
  0xf7   :  { %1007 = vmatpush.bf16.msra.mxu1 %v2754_v19 }
  0xf8   :  { %v3835_v28 = vadd.f32 %v3536_v22, %v567_v9  ;;  %1030 = vmatpush.bf16.msra.mxu3 %v2798_v48  ;;  %v3386_v22 = vld [vmem:[#allocation11 + $0x58] sm:$0xf0]  ;;  %1020 = vmatpush.bf16.msra.mxu2 %v2758_v25  ;;  %v2717_v48 = vld [vmem:[#allocation11] sm:$0xf] }
  0xf9   :  { %v2762_v26 = vor.u32 %v3386_v22, %v2761_v21  ;;  %v3382_v9 = vld [vmem:[#allocation11 + $0x38] sm:$0xf0] }
  0xfa   :  { %569 = vst [vmem:[#allocation12] sm:$0x1] %v3835_v28  ;;  %v572_v29 = vpack.c.bf16 %v3835_v28, %v3835_v28  ;;  %v2742_v31 = vor.u32 %v3382_v9, %v2741_v27  ;;  %v2899_v27 = vld [vmem:[#allocation11 + $0xa8] sm:$0xf]  ;;  %v3421_v9 = vld [vmem:[#allocation11 + $0xb0] sm:$0xf0] }
  0xfc   :  { %749 = vmatmul.bf16.vlgmr.msrb.gmra.mxu2 %v572_v29  ;;  %762 = vmatmul.bf16.vlgmr.msrb.gmra.mxu3 %v572_v29 }
  0xfd   :  { %775 = vmatmul.bf16.vlgmr.msra.gmra.mxu0 %v572_v29  ;;  %1031 = vmatpush.bf16.msra.mxu3 %v2786_v62  ;;  %v3381_v29 = vld [vmem:[#allocation11 + $0x34] sm:$0xf]  ;;  %v2722_v62 = vor.u32 %v3375_v53, %v2719_v54  ;;  %v2877_v53 = vld [vmem:[#allocation11 + $0x84] sm:$0xf0]  ;;  %v2883_v54 = vld [vmem:[#allocation11 + $0x80] sm:$0xf] }
  0xfe   :  { %v2746_v32 = vor.u32 %v3381_v29, %v2743_v30  ;;  %1008 = vmatpush.bf16.msra.mxu1 %v2742_v31  ;;  %v3420_v29 = vld [vmem:[#allocation11 + $0xac] sm:$0xf]  ;;  %v2900_v30 = vor.u32 %v3421_v9, %v2899_v27  ;;  %v2901_v31 = vld [vmem:[#allocation11 + $0xb4] sm:$0xf0]  ;;  %v3407_v9 = vld [vmem:[#allocation11 + $0x40] sm:$0xf0] }
  0xff   :  { %v2847_v27 = vld [vmem:[#allocation11 + $0x38] sm:$0xf] }
 0x100   :  { %1021 = vmatpush.bf16.msra.mxu2 %v2746_v32  ;;  %v2907_v32 = vld [vmem:[#allocation11 + $0xb0] sm:$0xf]  ;;  %1265 = vmatpush.bf16.msrb.mxu0 %v2900_v30 }
 0x101   :  { %1032 = vmatpush.bf16.msra.mxu3 %v2774_v13  ;;  %v2908_v34 = vor.u32 %v3422_v33, %v2907_v32  ;;  %v2827_v33 = vld [vmem:[#allocation11 + $0x18] sm:$0xf] }
 0x102   :  { %1009 = vmatpush.bf16.msra.mxu1 %v2730_v45  ;;  %v3865_v45 = vld [vmem:[%s4005_s5] sm:$0x7] }
 0x104   :  { %1022 = vmatpush.bf16.msra.mxu2 %v2734_v46  ;;  %v2875_v46 = vld [vmem:[#allocation11 + $0x78] sm:$0xf] }
 0x105   :  { %1033 = vmatpush.bf16.msra.mxu3 %v2762_v26 }
 0x108   :  { %1023 = vmatpush.bf16.msra.mxu2 %v2722_v62 }
 0x109   :  { %1034 = vmatpush.bf16.msra.mxu3 %v2750_v39 }
 0x10c   :  { %1291 = vmatpush.bf16.msrb.mxu2 %v2908_v34 }
 0x10d   :  { %1035 = vmatpush.bf16.msra.mxu3 %v2738_v47  ;;  %v3415_v47 = vld [vmem:[#allocation11 + $0x80] sm:$0xf0] }
 0x110   :  { %1292 = vmatpush.bf16.msrb.mxu2 %v2896_v44 }
 0x17a   :  { %v3847_v51 = vpop.f32.mrf.mxu0 }
 0x17b   :  { %v777_v13 = vadd.f32 %v3847_v51, %v737_v6  ;;  %v3868_v6 = vld [vmem:[#allocation2 + $0x2] ss:$8 sm:$0x7] }
 0x17f   :  { %v750_v3 = vpop.f32.mrf.mxu2  ;;  %v763_v4 = vpop.f32.mrf.mxu3 }
 0x180   :  { %v751_v10 = vadd.f32 %v750_v3, %v735_v59  ;;  %v764_v11 = vadd.f32 %v763_v4, %v736_v60  ;;  %v2718_v60 = vor.u32 %v3376_v52, %v2717_v48  ;;  %v3414_v48 = vld [vmem:[#allocation11 + $0x7c] sm:$0xf]  ;;  %v2876_v52 = vor.u32 %v3415_v47, %v2875_v46 }
 0x182   :  { %v780_v14 = vadd.f32 %v751_v10, %v3845_v50  ;;  %v803_v15 = vadd.f32 %v801_v63, %v764_v11  ;;  %v778_v36 = vpop.f32.mrf.mxu0  ;;  %v2726_v63 = vor.u32 %v3377_v56, %v2725_v55  ;;  %1010 = vmatpush.bf16.msra.mxu1 %v2718_v60  ;;  %v3416_v55 = vld [vmem:[#allocation11 + $0x88] sm:$0xf0]  ;;  %v997_v56 = vperm.slane %v3865_v45, 0 }
 0x183   :  { %v3412_v60 = vld [vmem:[#allocation11 + $0x68] sm:$0xf0] }
 0x184   :  { %v2713_v23 = vmul.f32 -1.442695, %v780_v14  ;;  %v2714_v24 = vmul.f32 -1.442695, %v803_v15  ;;  %1036 = vmatpush.bf16.msra.mxu3 %v2726_v63 }
 0x186   :  { %3537 = vpow2.f32 %v2713_v23 }
 0x187   :  { %3539 = vpow2.f32 %v2714_v24  ;;  %v752_v35 = vpop.f32.mrf.mxu2  ;;  %v765_v37 = vpop.f32.mrf.mxu3 }
 0x188   :  { %v3418_v35 = vld [vmem:[#allocation11 + $0x98] sm:$0xf0]  ;;  %v3417_v37 = vld [vmem:[#allocation11 + $0x94] sm:$0xf] }
 0x189   :  { %v2888_v39 = vor.u32 %v3418_v35, %v2887_v38  ;;  %v2892_v43 = vor.u32 %v3417_v37, %v2889_v40  ;;  %v3402_v38 = vld [vmem:[#allocation11 + $0x1c] sm:$0xf]  ;;  %v2829_v35 = vld [vmem:[#allocation11 + $0x24] sm:$0xf0]  ;;  %v2835_v37 = vld [vmem:[#allocation11 + $0x20] sm:$0xf] }
 0x18a   :  { %v2832_v40 = vor.u32 %v3402_v38, %v2829_v35  ;;  %v2836_v47 = vor.u32 %v3404_v41, %v2835_v37  ;;  %v3441_v38 = vld [vmem:[#allocation11 + $0x94] sm:$0xf]  ;;  %v2987_v37 = vld [vmem:[#allocation11 + $0x9c] sm:$0xf0] }
 0x18b   :  { %1266 = vmatpush.bf16.msrb.mxu0 %v2888_v39 }
 0x18c   :  { %v3538_v57 = vpop.eup %3537 }
 0x18d   :  { %v3540_v58 = vpop.eup %3539  ;;  %v784_v59 = vadd.f32 1.0, %v3538_v57  ;;  %v2880_v57 = vor.u32 %v3414_v48, %v2877_v53  ;;  %v2817_v53 = vld [vmem:[#allocation11 + $0xc] sm:$0xf0] }
 0x18e   :  { %v807_v61 = vadd.f32 1.0, %v3540_v58  ;;  %v2884_v58 = vor.u32 %v3416_v55, %v2883_v54 }
 0x18f   :  { %3541 = vrcp.f32 %v784_v59  ;;  %v796_v4 = vand.u32 2147483648, %v784_v59  ;;  %v794_v8 = vand.u32 2147483647, %v784_v59  ;;  %vm790_vm9 = vweird.f32 %v784_v59  ;;  %1267 = vmatpush.bf16.msrb.mxu0 %v2876_v52  ;;  %v3399_v52 = vld [vmem:[#allocation11 + $0x4] sm:$0xf] }
 0x190   :  { %3543 = vrcp.f32 %v807_v61  ;;  %v819_v19 = vand.u32 2147483648, %v807_v61  ;;  %vm813_vm13 = vweird.f32 %v807_v61  ;;  %v817_v20 = vand.u32 2147483647, %v807_v61  ;;  %1293 = vmatpush.bf16.msrb.mxu2 %v2884_v58 }
 0x191   :  { %v797_v11 = vor.u32 1.1754944e-38, %v796_v4  ;;  %vm795_vm11 = vcmp.eq.f32.partialorder %v794_v8, 8.507059e+37  ;;  %v2820_v55 = vor.u32 %v3399_v52, %v2817_v53  ;;  %v3438_v52 = vld [vmem:[#allocation11 + $0x7c] sm:$0xf] }
 0x192   :  { %v820_v23 = vor.u32 1.1754944e-38, %v819_v19  ;;  %vm818_vm15 = vcmp.eq.f32.partialorder %v817_v20, 8.507059e+37  ;;  %v1063_v19 = vrot.slane %v3868_v6, 1 }
 0x195   :  { %v3542_v0 = vpop.eup %3541 }
 0x196   :  { %v3544_v1 = vpop.eup %3543  ;;  %v786_v2 = vmul.f32 %v3542_v0, %v784_v59  ;;  %vm791_vm8 = vweird.f32 %v3542_v0  ;;  %v2863_v59 = vld [vmem:[#allocation11 + $0x60] sm:$0xf] }
 0x197   :  { %v809_v5 = vmul.f32 %v3544_v1, %v807_v61  ;;  %vm792_vm10 = vmor %vm790_vm9, %vm791_vm8  ;;  %vm814_vm12 = vweird.f32 %v3544_v1  ;;  %v3411_v61 = vld [vmem:[#allocation11 + $0x64] sm:$0xf]  ;;  %v2864_v63 = vor.u32 %v3412_v60, %v2863_v59 }
 0x198   :  { %v787_v3 = vsub.f32 1.0, %v786_v2  ;;  %vm815_vm14 = vmor %vm813_vm13, %vm814_vm12  ;;  %v3413_v2 = vld [vmem:[#allocation11 + $0x70] sm:$0xf0] }
 0x199   :  { %v810_v12 = vsub.f32 1.0, %v809_v5  ;;  %1268 = vmatpush.bf16.msrb.mxu0 %v2864_v63 }
 0x19a   :  { %v788_v7 = vmul.f32 %v3542_v0, %v787_v3 }
 0x19b   :  { %v811_v17 = vmul.f32 %v3544_v1, %v810_v12  ;;  %v3408_v12 = vld [vmem:[#allocation11 + $0x4c] sm:$0xf] }
 0x19c   :  { %v789_v10 = vadd.f32 %v3542_v0, %v788_v7  ;;  %v998_v7 = vperm.slane %v3865_v45, 1 }
 0x19d   :  { %v812_v49 = vadd.f32 %v3544_v1, %v811_v17 }
 0x19e   :  { %v793_v14 = vsel %vm792_vm10, %v3542_v0, %v789_v10  ;;  %v2865_v0 = vld [vmem:[#allocation11 + $0x6c] sm:$0xf0]  ;;  %v2851_v10 = vld [vmem:[#allocation11 + $0x48] sm:$0xf] }
 0x19f   :  { %v798_v15 = vsel %vm795_vm11, %v797_v11, %v793_v14  ;;  %v816_v21 = vsel %vm815_vm14, %v3544_v1, %v812_v49  ;;  %v2871_v1 = vld [vmem:[#allocation11 + $0x68] sm:$0xf]  ;;  %v2868_v4 = vor.u32 %v3411_v61, %v2865_v0  ;;  %v3409_v11 = vld [vmem:[#allocation11 + $0x50] sm:$0xf0]  ;;  %v2853_v14 = vld [vmem:[#allocation11 + $0x54] sm:$0xf0] }
 0x1a0   :  { %v823_v36 = vmul.f32 %v798_v15, %v777_v13  ;;  %v821_v24 = vsel %vm818_vm15, %v820_v23, %v816_v21  ;;  %v2872_v5 = vor.u32 %v3413_v2, %v2871_v1  ;;  %v2852_v13 = vor.u32 %v3409_v11, %v2851_v10  ;;  %v2859_v15 = vld [vmem:[#allocation11 + $0x50] sm:$0xf]  ;;  %v3406_v23 = vld [vmem:[#allocation11 + $0x38] sm:$0xf0] }
 0x1a1   :  { %v2856_v17 = vor.u32 %v3408_v12, %v2853_v14  ;;  %v999_v1 = vperm.slane %v3865_v45, 2 }
 0x1a2   :  { %v826_v18 = vadd.f32 %v824_v16, %v823_v36  ;;  %1294 = vmatpush.bf16.msrb.mxu2 %v2872_v5  ;;  %v3410_v36 = vld [vmem:[#allocation11 + $0x58] sm:$0xf0]  ;;  %1269 = vmatpush.bf16.msrb.mxu0 %v2852_v13 }
 0x1a4   :  { %3545 = vtanh.f32 %v826_v18  ;;  %v2860_v18 = vor.u32 %v3410_v36, %v2859_v15  ;;  %v1086_v15 = vrot.slane %v3868_v6, 2 }
 0x1a6   :  { %1295 = vmatpush.bf16.msrb.mxu2 %v2860_v18 }
 0x1aa   :  { %v3546_v22 = vpop.eup %3545 }
 0x1ab   :  { %v828_v51 = vsub.f32 %v3835_v28, %v3546_v22  ;;  %v2904_v28 = vor.u32 %v3420_v29, %v2901_v31  ;;  %v2848_v31 = vor.u32 %v3407_v9, %v2847_v27  ;;  %v2999_v9 = vld [vmem:[#allocation11 + $0xb4] sm:$0xf0] }
 0x1ad   :  { %v829_v25 = vmul.f32 %v828_v51, %v821_v24  ;;  %1278 = vmatpush.bf16.msrb.mxu1 %v2904_v28  ;;  %v3405_v51 = vld [vmem:[#allocation11 + $0x34] sm:$0xf]  ;;  %1296 = vmatpush.bf16.msrb.mxu2 %v2848_v31  ;;  %v3403_v28 = vld [vmem:[#allocation11 + $0x20] sm:$0xf0] }
 0x1ae   :  { %v2828_v34 = vor.u32 %v3403_v28, %v2827_v33  ;;  %v3889_v33 = vld [vmem:[%s4005_s5] sm:$0x7]  ;;  %v2985_v28 = vld [vmem:[#allocation11 + $0x90] sm:$0xf] }
 0x1af   :  { %v3857_v26 = vadd.f32 %v3546_v22, %v829_v25  ;;  %v2839_v22 = vld [vmem:[#allocation11 + $0x30] sm:$0xf]  ;;  %v1259_v41 = vperm.slane %v3889_v33, 0 }
 0x1b0   :  { %v2840_v25 = vor.u32 %v3406_v23, %v2839_v22 }
 0x1b1   :  { %831 = vst [vmem:[#allocation12 + $0x1] sm:$0x1] %v3857_v26  ;;  %v834_v50 = vpack.c.bf16 %v3857_v26, %v3857_v26  ;;  %1279 = vmatpush.bf16.msrb.mxu1 %v2892_v43  ;;  %v3400_v43 = vld [vmem:[#allocation11 + $0x8] sm:$0xf0]  ;;  %1297 = vmatpush.bf16.msrb.mxu2 %v2836_v47  ;;  %v2973_v47 = vld [vmem:[#allocation11 + $0x78] sm:$0xf] }
 0x1b2   :  { %1270 = vmatpush.bf16.msrb.mxu0 %v2840_v25  ;;  %v2816_v48 = vor.u32 %v3400_v43, %v2815_v42  ;;  %v3445_v25 = vld [vmem:[#allocation11 + $0xb0] sm:$0xf0]  ;;  %v1260_v42 = vperm.slane %v3889_v33, 1  ;;  %v2990_v43 = vor.u32 %v3441_v38, %v2987_v37 }
 0x1b3   :  { %1011 = vmatmul.bf16.vlgmr.msra.gmra.mxu1 %v834_v50  ;;  %1024 = vmatmul.bf16.vlgmr.msra.gmra.mxu2 %v834_v50 }
 0x1b4   :  { %1037 = vmatmul.bf16.vlgmr.msra.gmra.mxu3 %v834_v50  ;;  %v2841_v50 = vld [vmem:[#allocation11 + $0x3c] sm:$0xf0] }
 0x1b5   :  { %1280 = vmatpush.bf16.msrb.mxu1 %v2880_v57  ;;  %v2844_v30 = vor.u32 %v3405_v51, %v2841_v50  ;;  %v3401_v57 = vld [vmem:[#allocation11 + $0x10] sm:$0xf0]  ;;  %v3444_v50 = vld [vmem:[#allocation11 + $0xac] sm:$0xf] }
 0x1b6   :  { %1271 = vmatpush.bf16.msrb.mxu0 %v2828_v34  ;;  %v3442_v34 = vld [vmem:[#allocation11 + $0x98] sm:$0xf0] }
 0x1b7   :  { %v2986_v35 = vor.u32 %v3442_v34, %v2985_v28  ;;  %v3427_v28 = vld [vmem:[#allocation11 + $0x20] sm:$0xf0]  ;;  %v3426_v34 = vld [vmem:[#allocation11 + $0x1c] sm:$0xf] }
 0x1b9   :  { %1281 = vmatpush.bf16.msrb.mxu1 %v2868_v4 }
 0x1ba   :  { %1272 = vmatpush.bf16.msrb.mxu0 %v2816_v48  ;;  %v3439_v48 = vld [vmem:[#allocation11 + $0x80] sm:$0xf0] }
 0x1bd   :  { %1282 = vmatpush.bf16.msrb.mxu1 %v2856_v17 }
 0x1c1   :  { %1283 = vmatpush.bf16.msrb.mxu1 %v2844_v30  ;;  %v3002_v30 = vor.u32 %v3444_v50, %v2999_v9  ;;  %v2939_v50 = vld [vmem:[#allocation11 + $0x3c] sm:$0xf0]  ;;  %v3431_v9 = vld [vmem:[#allocation11 + $0x40] sm:$0xf0] }
 0x1c3   :  { %1540 = vmatpush.bf16.msra.mxu0 %v3002_v30 }
 0x1c5   :  { %1284 = vmatpush.bf16.msrb.mxu1 %v2832_v40  ;;  %v3443_v40 = vld [vmem:[#allocation11 + $0xa0] sm:$0xf0] }
 0x1c7   :  { %1541 = vmatpush.bf16.msra.mxu0 %v2990_v43 }
 0x1c9   :  { %1285 = vmatpush.bf16.msrb.mxu1 %v2820_v55  ;;  %v2974_v55 = vor.u32 %v3439_v48, %v2973_v47  ;;  %v3424_v47 = vld [vmem:[#allocation11 + $0x8] sm:$0xf0] }
 0x230   :  { %v1012_v62 = vpop.f32.mrf.mxu1 }
 0x231   :  { %v1013_v3 = vadd.f32 %v1012_v62, %v997_v56  ;;  %v2823_v56 = vld [vmem:[#allocation11 + $0x8] sm:$0xf] }
 0x232   :  { %v2824_v58 = vor.u32 %v3401_v57, %v2823_v56  ;;  %v2975_v56 = vld [vmem:[#allocation11 + $0x84] sm:$0xf0]  ;;  %v2981_v57 = vld [vmem:[#allocation11 + $0x80] sm:$0xf] }
 0x233   :  { %v1042_v8 = vadd.f32 %v1013_v3, %v3868_v6 }
 0x234   :  { %1298 = vmatpush.bf16.msrb.mxu2 %v2824_v58  ;;  %v3440_v58 = vld [vmem:[#allocation11 + $0x88] sm:$0xf0] }
 0x235   :  { %v2811_v16 = vmul.f32 -1.442695, %v1042_v8 }
 0x236   :  { %v1025_v49 = vpop.f32.mrf.mxu2 }
 0x237   :  { %3547 = vpow2.f32 %v2811_v16  ;;  %v1026_v20 = vadd.f32 %v1025_v49, %v998_v7  ;;  %v3873_v21 = vpop.f32.mrf.mxu3 }
 0x238   :  { %v1014_v24 = vpop.f32.mrf.mxu1  ;;  %v1039_v11 = vadd.f32 %v3873_v21, %v999_v1  ;;  %v2961_v1 = vld [vmem:[#allocation11 + $0x60] sm:$0xf] }
 0x239   :  { %v1065_v29 = vadd.f32 %v1063_v19, %v1026_v20  ;;  %v2997_v24 = vld [vmem:[#allocation11 + $0xa8] sm:$0xf] }
 0x23a   :  { %v2998_v27 = vor.u32 %v3445_v25, %v2997_v24  ;;  %v3429_v24 = vld [vmem:[#allocation11 + $0x34] sm:$0xf] }
 0x23b   :  { %v2812_v32 = vmul.f32 -1.442695, %v1065_v29  ;;  %v3005_v29 = vld [vmem:[#allocation11 + $0xb0] sm:$0xf] }
 0x23c   :  { %1527 = vmatpush.bf16.msrb.mxu3 %v2998_v27  ;;  %v2945_v27 = vld [vmem:[#allocation11 + $0x38] sm:$0xf] }
 0x23d   :  { %v3548_v39 = vpop.eup %3547  ;;  %3549 = vpow2.f32 %v2812_v32  ;;  %v3884_v32 = vld [vmem:[#allocation2 + $0x3] ss:$8 sm:$0x7]  ;;  %v2946_v30 = vor.u32 %v3431_v9, %v2945_v27  ;;  %v3097_v27 = vld [vmem:[#allocation11 + $0xb4] sm:$0xf0] }
 0x23e   :  { %v1046_v44 = vadd.f32 1.0, %v3548_v39  ;;  %v1027_v46 = vpop.f32.mrf.mxu2  ;;  %v2993_v39 = vld [vmem:[#allocation11 + $0x98] sm:$0xf]  ;;  %v3103_v9 = vld [vmem:[#allocation11 + $0xb0] sm:$0xf] }
 0x23f   :  { %v1040_v54 = vpop.f32.mrf.mxu3  ;;  %v1325_v46 = vrot.slane %v3884_v32, 1 }
 0x240   :  { %3551 = vrcp.f32 %v1046_v44  ;;  %v1058_v0 = vand.u32 2147483648, %v1046_v44  ;;  %v1056_v3 = vand.u32 2147483647, %v1046_v44  ;;  %vm1052_vm1 = vweird.f32 %v1046_v44  ;;  %1528 = vmatpush.bf16.msrb.mxu3 %v2986_v35 }
 0x242   :  { %v1059_v8 = vor.u32 1.1754944e-38, %v1058_v0  ;;  %vm1057_vm3 = vcmp.eq.f32.partialorder %v1056_v3, 8.507059e+37  ;;  %v3435_v3 = vld [vmem:[#allocation11 + $0x64] sm:$0xf] }
 0x243   :  { %v3550_v59 = vpop.eup %3549 }
 0x244   :  { %v1069_v60 = vadd.f32 1.0, %v3550_v59  ;;  %1529 = vmatpush.bf16.msrb.mxu3 %v2974_v55  ;;  %v2921_v55 = vld [vmem:[#allocation11 + $0x8] sm:$0xf] }
 0x246   :  { %v3552_v61 = vpop.eup %3551  ;;  %3553 = vrcp.f32 %v1069_v60  ;;  %v1081_v17 = vand.u32 2147483648, %v1069_v60  ;;  %vm1075_vm5 = vweird.f32 %v1069_v60  ;;  %v1079_v18 = vand.u32 2147483647, %v1069_v60 }
 0x247   :  { %v1048_v62 = vmul.f32 %v3552_v61, %v1046_v44  ;;  %vm1053_vm0 = vweird.f32 %v3552_v61  ;;  %v2994_v44 = vor.u32 %v3443_v40, %v2993_v39  ;;  %v2927_v39 = vld [vmem:[#allocation11 + $0x24] sm:$0xf0]  ;;  %v2933_v40 = vld [vmem:[#allocation11 + $0x20] sm:$0xf] }
 0x248   :  { %vm1054_vm2 = vmor %vm1052_vm1, %vm1053_vm0  ;;  %v1082_v20 = vor.u32 1.1754944e-38, %v1081_v17  ;;  %vm1080_vm7 = vcmp.eq.f32.partialorder %v1079_v18, 8.507059e+37  ;;  %v2930_v43 = vor.u32 %v3426_v34, %v2927_v39  ;;  %v3466_v39 = vld [vmem:[#allocation11 + $0x98] sm:$0xf0] }
 0x249   :  { %v1049_v63 = vsub.f32 1.0, %v1048_v62  ;;  %v2982_v62 = vor.u32 %v3440_v58, %v2981_v57 }
 0x24b   :  { %v1050_v2 = vmul.f32 %v3552_v61, %v1049_v63 }
 0x24c   :  { %v3554_v4 = vpop.eup %3553 }
 0x24d   :  { %v1071_v5 = vmul.f32 %v3554_v4, %v1069_v60  ;;  %v1051_v7 = vadd.f32 %v3552_v61, %v1050_v2  ;;  %vm1076_vm4 = vweird.f32 %v3554_v4  ;;  %v3436_v2 = vld [vmem:[#allocation11 + $0x68] sm:$0xf0] }
 0x24e   :  { %vm1077_vm6 = vmor %vm1075_vm5, %vm1076_vm4 }
 0x24f   :  { %v1072_v10 = vsub.f32 1.0, %v1071_v5  ;;  %v1055_v12 = vsel %vm1054_vm2, %v3552_v61, %v1051_v7  ;;  %v2978_v61 = vor.u32 %v3438_v52, %v2975_v56  ;;  %v2963_v5 = vld [vmem:[#allocation11 + $0x6c] sm:$0xf0]  ;;  %v2969_v7 = vld [vmem:[#allocation11 + $0x68] sm:$0xf] }
 0x250   :  { %v1060_v13 = vsel %vm1057_vm3, %v1059_v8, %v1055_v12  ;;  %v3437_v8 = vld [vmem:[#allocation11 + $0x70] sm:$0xf0]  ;;  %v2966_v12 = vor.u32 %v3435_v3, %v2963_v5  ;;  %v3423_v52 = vld [vmem:[#allocation11 + $0x4] sm:$0xf] }
 0x251   :  { %v1085_v14 = vmul.f32 %v1060_v13, %v1039_v11  ;;  %v1073_v36 = vmul.f32 %v3554_v4, %v1072_v10  ;;  %1542 = vmatpush.bf16.msra.mxu0 %v2978_v61  ;;  %v2970_v13 = vor.u32 %v3437_v8, %v2969_v7  ;;  %v3425_v56 = vld [vmem:[#allocation11 + $0x10] sm:$0xf0] }
 0x252   :  { %v2922_v58 = vor.u32 %v3425_v56, %v2921_v55  ;;  %v3463_v55 = vld [vmem:[#allocation11 + $0x80] sm:$0xf0]  ;;  %v3462_v56 = vld [vmem:[#allocation11 + $0x7c] sm:$0xf] }
 0x253   :  { %v1088_v45 = vadd.f32 %v1086_v15, %v1085_v14  ;;  %v1074_v16 = vadd.f32 %v3554_v4, %v1073_v36  ;;  %v2949_v15 = vld [vmem:[#allocation11 + $0x48] sm:$0xf]  ;;  %v3433_v36 = vld [vmem:[#allocation11 + $0x50] sm:$0xf0] }
 0x254   :  { %v2950_v18 = vor.u32 %v3433_v36, %v2949_v15 }
 0x255   :  { %3555 = vtanh.f32 %v1088_v45  ;;  %v1078_v49 = vsel %vm1077_vm6, %v3554_v4, %v1074_v16  ;;  %v2962_v4 = vor.u32 %v3436_v2, %v2961_v1  ;;  %1543 = vmatpush.bf16.msra.mxu0 %v2966_v12  ;;  %v3432_v45 = vld [vmem:[#allocation11 + $0x4c] sm:$0xf]  ;;  %v1261_v1 = vperm.slane %v3889_v33, 2 }
 0x256   :  { %v1083_v22 = vsel %vm1080_vm7, %v1082_v20, %v1078_v49  ;;  %v2951_v49 = vld [vmem:[#allocation11 + $0x54] sm:$0xf0]  ;;  %v3434_v20 = vld [vmem:[#allocation11 + $0x58] sm:$0xf0] }
 0x257   :  { %1530 = vmatpush.bf16.msrb.mxu3 %v2962_v4 }
 0x25b   :  { %v3556_v19 = vpop.eup %3555  ;;  %1531 = vmatpush.bf16.msrb.mxu3 %v2950_v18 }
 0x25c   :  { %v1090_v21 = vsub.f32 %v3857_v26, %v3556_v19  ;;  %v3446_v26 = vld [vmem:[#allocation11 + $0xb8] sm:$0xf0] }
 0x25d   :  { %v3006_v31 = vor.u32 %v3446_v26, %v3005_v29  ;;  %v2942_v26 = vor.u32 %v3429_v24, %v2939_v50  ;;  %v3469_v24 = vld [vmem:[#allocation11 + $0xb0] sm:$0xf0] }
 0x25e   :  { %v1091_v23 = vmul.f32 %v1090_v21, %v1083_v22  ;;  %v2954_v21 = vor.u32 %v3432_v45, %v2951_v49 }
 0x25f   :  { %1553 = vmatpush.bf16.msra.mxu1 %v3006_v31  ;;  %v2925_v31 = vld [vmem:[#allocation11 + $0x18] sm:$0xf] }
 0x260   :  { %v3879_v51 = vadd.f32 %v3556_v19, %v1091_v23  ;;  %v2957_v19 = vld [vmem:[#allocation11 + $0x50] sm:$0xf]  ;;  %1544 = vmatpush.bf16.msra.mxu0 %v2954_v21  ;;  %v2926_v37 = vor.u32 %v3427_v28, %v2925_v31 }
 0x261   :  { %v2958_v22 = vor.u32 %v3434_v20, %v2957_v19  ;;  %v2937_v23 = vld [vmem:[#allocation11 + $0x30] sm:$0xf] }
 0x262   :  { %1093 = vst [vmem:[#allocation12 + $0x2] sm:$0x1] %v3879_v51  ;;  %v1096_v6 = vpack.c.bf16 %v3879_v51, %v3879_v51 }
 0x263   :  { %1554 = vmatpush.bf16.msra.mxu1 %v2994_v44  ;;  %v3428_v44 = vld [vmem:[#allocation11 + $0x28] sm:$0xf0] }
 0x264   :  { %1273 = vmatmul.bf16.vlgmr.msrb.gmra.mxu0 %v1096_v6  ;;  %1286 = vmatmul.bf16.vlgmr.msrb.gmra.mxu1 %v1096_v6  ;;  %v2934_v48 = vor.u32 %v3428_v44, %v2933_v40  ;;  %v3465_v40 = vld [vmem:[#allocation11 + $0x94] sm:$0xf]  ;;  %v3091_v44 = vld [vmem:[#allocation11 + $0x98] sm:$0xf] }
 0x265   :  { %1299 = vmatmul.bf16.vlgmr.msrb.gmra.mxu2 %v1096_v6  ;;  %v3430_v6 = vld [vmem:[#allocation11 + $0x38] sm:$0xf0]  ;;  %1545 = vmatpush.bf16.msra.mxu0 %v2942_v26 }
 0x266   :  { %v2938_v25 = vor.u32 %v3430_v6, %v2937_v23  ;;  %v3911_v23 = vld [vmem:[#allocation2 + $0x4] ss:$8 sm:$0x7]  ;;  %v3095_v6 = vld [vmem:[#allocation11 + $0xa8] sm:$0xf] }
 0x267   :  { %1555 = vmatpush.bf16.msra.mxu1 %v2982_v62  ;;  %v3096_v50 = vor.u32 %v3469_v24, %v3095_v6  ;;  %v1587_v34 = vrot.slane %v3911_v23, 1  ;;  %v3454_v6 = vld [vmem:[#allocation11 + $0x38] sm:$0xf0]  ;;  %v3453_v24 = vld [vmem:[#allocation11 + $0x34] sm:$0xf] }
 0x268   :  { %1532 = vmatpush.bf16.msrb.mxu3 %v2938_v25  ;;  %v3468_v25 = vld [vmem:[#allocation11 + $0xac] sm:$0xf] }
 0x269   :  { %1546 = vmatpush.bf16.msra.mxu0 %v2930_v43  ;;  %1789 = vmatpush.bf16.msra.mxu2 %v3096_v50  ;;  %v3085_v43 = vld [vmem:[#allocation11 + $0x9c] sm:$0xf0]  ;;  %v3043_v50 = vld [vmem:[#allocation11 + $0x38] sm:$0xf] }
 0x26b   :  { %1556 = vmatpush.bf16.msra.mxu1 %v2970_v13  ;;  %v1348_v13 = vrot.slane %v3884_v32, 2 }
 0x26c   :  { %1533 = vmatpush.bf16.msrb.mxu3 %v2926_v37  ;;  %v3083_v37 = vld [vmem:[#allocation11 + $0x90] sm:$0xf] }
 0x26f   :  { %1557 = vmatpush.bf16.msra.mxu1 %v2958_v22  ;;  %v3909_v22 = vld [vmem:[%s4005_s5] sm:$0x7] }
 0x273   :  { %1558 = vmatpush.bf16.msra.mxu1 %v2946_v30  ;;  %v3100_v30 = vor.u32 %v3468_v25, %v3097_v27  ;;  %v3037_v25 = vld [vmem:[#allocation11 + $0x3c] sm:$0xf0]  ;;  %v3455_v27 = vld [vmem:[#allocation11 + $0x40] sm:$0xf0] }
 0x277   :  { %1559 = vmatpush.bf16.msra.mxu1 %v2934_v48 }
 0x27b   :  { %1560 = vmatpush.bf16.msra.mxu1 %v2922_v58 }
 0x2e1   :  { %v1274_v53 = vpop.f32.mrf.mxu0  ;;  %v1287_v54 = vpop.f32.mrf.mxu1 }
 0x2e2   :  { %v1275_v59 = vadd.f32 %v1274_v53, %v1259_v41  ;;  %v1288_v60 = vadd.f32 %v1287_v54, %v1260_v42  ;;  %v2915_v53 = vld [vmem:[#allocation11 + $0xc] sm:$0xf0] }
 0x2e3   :  { %v2918_v57 = vor.u32 %v3423_v52, %v2915_v53 }
 0x2e4   :  { %v1304_v63 = vadd.f32 %v1275_v59, %v3884_v32  ;;  %v1327_v0 = vadd.f32 %v1325_v46, %v1288_v60  ;;  %v2913_v46 = vld [vmem:[#allocation11] sm:$0xf] }
 0x2e5   :  { %v2914_v54 = vor.u32 %v3424_v47, %v2913_v46  ;;  %1547 = vmatpush.bf16.msra.mxu0 %v2918_v57  ;;  %v3467_v46 = vld [vmem:[#allocation11 + $0xa0] sm:$0xf0]  ;;  %v3088_v47 = vor.u32 %v3465_v40, %v3085_v43  ;;  %v3452_v40 = vld [vmem:[#allocation11 + $0x28] sm:$0xf0] }
 0x2e6   :  { %v2909_v10 = vmul.f32 -1.442695, %v1304_v63  ;;  %v2910_v11 = vmul.f32 -1.442695, %v1327_v0  ;;  %v3092_v48 = vor.u32 %v3467_v46, %v3091_v44  ;;  %v3011_v46 = vld [vmem:[#allocation11] sm:$0xf] }
 0x2e7   :  { %1534 = vmatpush.bf16.msrb.mxu3 %v2914_v54  ;;  %v3071_v54 = vld [vmem:[#allocation11 + $0x78] sm:$0xf] }
 0x2e8   :  { %3557 = vpow2.f32 %v2909_v10  ;;  %v3895_v14 = vpop.f32.mrf.mxu2  ;;  %v3072_v58 = vor.u32 %v3463_v55, %v3071_v54  ;;  %v3449_v54 = vld [vmem:[#allocation11 + $0x10] sm:$0xf0] }
 0x2e9   :  { %3559 = vpow2.f32 %v2910_v11  ;;  %v1276_v16 = vpop.f32.mrf.mxu0  ;;  %v1289_v17 = vpop.f32.mrf.mxu1  ;;  %v1301_v8 = vadd.f32 %v3895_v14, %v1261_v1  ;;  %v3059_v1 = vld [vmem:[#allocation11 + $0x60] sm:$0xf] }
 0x2eb   :  { %1802 = vmatpush.bf16.msra.mxu3 %v3100_v30  ;;  %v3044_v30 = vor.u32 %v3455_v27, %v3043_v50 }
 0x2ee   :  { %v3558_v29 = vpop.eup %3557 }
 0x2ef   :  { %v3560_v38 = vpop.eup %3559  ;;  %v1308_v35 = vadd.f32 1.0, %v3558_v29  ;;  %v3470_v29 = vld [vmem:[#allocation11 + $0xb8] sm:$0xf0]  ;;  %1803 = vmatpush.bf16.msra.mxu3 %v3088_v47  ;;  %v3448_v47 = vld [vmem:[#allocation11 + $0x8] sm:$0xf0] }
 0x2f0   :  { %v1331_v41 = vadd.f32 1.0, %v3560_v38  ;;  %v1302_v42 = vpop.f32.mrf.mxu2  ;;  %v3104_v31 = vor.u32 %v3470_v29, %v3103_v9  ;;  %v3012_v55 = vor.u32 %v3448_v47, %v3011_v46  ;;  %v3169_v47 = vld [vmem:[#allocation11 + $0x78] sm:$0xf] }
 0x2f1   :  { %3561 = vrcp.f32 %v1308_v35  ;;  %v1320_v0 = vand.u32 2147483648, %v1308_v35  ;;  %v1318_v3 = vand.u32 2147483647, %v1308_v35  ;;  %vm1314_vm9 = vweird.f32 %v1308_v35 }
 0x2f2   :  { %3563 = vrcp.f32 %v1331_v41  ;;  %v1343_v45 = vand.u32 2147483648, %v1331_v41  ;;  %vm1337_vm13 = vweird.f32 %v1331_v41  ;;  %v1341_v16 = vand.u32 2147483647, %v1331_v41  ;;  %1815 = vmatpush.bf16.msrb.mxu0 %v3104_v31  ;;  %v3023_v31 = vld [vmem:[#allocation11 + $0x18] sm:$0xf] }
 0x2f3   :  { %v1321_v7 = vor.u32 1.1754944e-38, %v1320_v0  ;;  %vm1319_vm11 = vcmp.eq.f32.partialorder %v1318_v3, 8.507059e+37  ;;  %v3084_v42 = vor.u32 %v3466_v39, %v3083_v37  ;;  %v3459_v3 = vld [vmem:[#allocation11 + $0x64] sm:$0xf]  ;;  %v3025_v37 = vld [vmem:[#allocation11 + $0x24] sm:$0xf0] }
 0x2f4   :  { %v1344_v49 = vor.u32 1.1754944e-38, %v1343_v45  ;;  %vm1342_vm15 = vcmp.eq.f32.partialorder %v1341_v16, 8.507059e+37  ;;  %v3049_v16 = vld [vmem:[#allocation11 + $0x54] sm:$0xf0]  ;;  %v3031_v39 = vld [vmem:[#allocation11 + $0x20] sm:$0xf] }
 0x2f5   :  { %1790 = vmatpush.bf16.msra.mxu2 %v3084_v42  ;;  %v3032_v44 = vor.u32 %v3452_v40, %v3031_v39  ;;  %v3189_v39 = vld [vmem:[#allocation11 + $0x98] sm:$0xf]  ;;  %v3491_v40 = vld [vmem:[#allocation11 + $0xa0] sm:$0xf0] }
 0x2f6   :  { %1816 = vmatpush.bf16.msrb.mxu0 %v3092_v48  ;;  %v3447_v48 = vld [vmem:[#allocation11 + $0x4] sm:$0xf] }
 0x2f7   :  { %v3562_v59 = vpop.eup %3561 }
 0x2f8   :  { %v3564_v60 = vpop.eup %3563  ;;  %v1310_v61 = vmul.f32 %v3562_v59, %v1308_v35  ;;  %vm1315_vm8 = vweird.f32 %v3562_v59  ;;  %v1521_v35 = vperm.slane %v3909_v22, 0 }
 0x2f9   :  { %v1333_v63 = vmul.f32 %v3564_v60, %v1331_v41  ;;  %vm1316_vm10 = vmor %vm1314_vm9, %vm1315_vm8  ;;  %vm1338_vm12 = vweird.f32 %v3564_v60  ;;  %1791 = vmatpush.bf16.msra.mxu2 %v3072_v58 }
 0x2fa   :  { %v1311_v62 = vsub.f32 1.0, %v1310_v61  ;;  %vm1339_vm14 = vmor %vm1337_vm13, %vm1338_vm12  ;;  %v3464_v61 = vld [vmem:[#allocation11 + $0x88] sm:$0xf0] }
 0x2fb   :  { %v1334_v5 = vsub.f32 1.0, %v1333_v63 }
 0x2fc   :  { %v1312_v2 = vmul.f32 %v3562_v59, %v1311_v62 }
 0x2fd   :  { %v1335_v15 = vmul.f32 %v3564_v60, %v1334_v5 }
 0x2fe   :  { %v1313_v4 = vadd.f32 %v3562_v59, %v1312_v2  ;;  %v3460_v2 = vld [vmem:[#allocation11 + $0x68] sm:$0xf0] }
 0x2ff   :  { %v1336_v33 = vadd.f32 %v3564_v60, %v1335_v15  ;;  %v3047_v15 = vld [vmem:[#allocation11 + $0x48] sm:$0xf] }
 0x300   :  { %v1317_v10 = vsel %vm1316_vm10, %v3562_v59, %v1313_v4  ;;  %v3073_v59 = vld [vmem:[#allocation11 + $0x84] sm:$0xf0] }
 0x301   :  { %v1322_v11 = vsel %vm1319_vm11, %v1321_v7, %v1317_v10  ;;  %v1340_v17 = vsel %vm1339_vm14, %v3564_v60, %v1336_v33  ;;  %v3079_v60 = vld [vmem:[#allocation11 + $0x80] sm:$0xf]  ;;  %v3076_v63 = vor.u32 %v3462_v56, %v3073_v59  ;;  %v3060_v7 = vor.u32 %v3460_v2, %v3059_v1  ;;  %v3067_v10 = vld [vmem:[#allocation11 + $0x68] sm:$0xf]  ;;  %v3456_v33 = vld [vmem:[#allocation11 + $0x4c] sm:$0xf] }
 0x302   :  { %v1347_v12 = vmul.f32 %v1322_v11, %v1301_v8  ;;  %v1345_v19 = vsel %vm1342_vm15, %v1344_v49, %v1340_v17  ;;  %v3080_v0 = vor.u32 %v3464_v61, %v3079_v60  ;;  %v3061_v8 = vld [vmem:[#allocation11 + $0x6c] sm:$0xf0]  ;;  %v3461_v11 = vld [vmem:[#allocation11 + $0x70] sm:$0xf0] }
 0x303   :  { %1804 = vmatpush.bf16.msra.mxu3 %v3076_v63  ;;  %v3055_v17 = vld [vmem:[#allocation11 + $0x50] sm:$0xf]  ;;  %1792 = vmatpush.bf16.msra.mxu2 %v3060_v7 }
 0x304   :  { %v1350_v36 = vadd.f32 %v1348_v13, %v1347_v12  ;;  %1817 = vmatpush.bf16.msrb.mxu0 %v3080_v0  ;;  %v3064_v12 = vor.u32 %v3459_v3, %v3061_v8  ;;  %v3068_v13 = vor.u32 %v3461_v11, %v3067_v10  ;;  %v1523_v0 = vperm.slane %v3909_v22, 2 }
 0x305   :  { %v1610_v11 = vrot.slane %v3911_v23, 2 }
 0x306   :  { %3565 = vtanh.f32 %v1350_v36  ;;  %v3457_v36 = vld [vmem:[#allocation11 + $0x50] sm:$0xf0] }
 0x307   :  { %v3048_v49 = vor.u32 %v3457_v36, %v3047_v15  ;;  %1805 = vmatpush.bf16.msra.mxu3 %v3064_v12 }
 0x308   :  { %1818 = vmatpush.bf16.msrb.mxu0 %v3068_v13 }
 0x309   :  { %1793 = vmatpush.bf16.msra.mxu2 %v3048_v49 }
 0x30c   :  { %v3566_v18 = vpop.eup %3565 }
 0x30d   :  { %v1352_v14 = vsub.f32 %v3879_v51, %v3566_v18  ;;  %v1522_v51 = vperm.slane %v3909_v22, 1 }
 0x30f   :  { %v1353_v20 = vmul.f32 %v1352_v14, %v1345_v19 }
 0x311   :  { %v3901_v21 = vadd.f32 %v3566_v18, %v1353_v20  ;;  %v3458_v18 = vld [vmem:[#allocation11 + $0x58] sm:$0xf0]  ;;  %v3052_v20 = vor.u32 %v3456_v33, %v3049_v16 }
 0x313   :  { %1355 = vst [vmem:[#allocation12 + $0x3] sm:$0x1] %v3901_v21  ;;  %v1358_v32 = vpack.c.bf16 %v3901_v21, %v3901_v21  ;;  %1806 = vmatpush.bf16.msra.mxu3 %v3052_v20  ;;  %v3493_v20 = vld [vmem:[#allocation11 + $0xb0] sm:$0xf0] }
 0x315   :  { %1535 = vmatmul.bf16.vlgmr.msrb.gmra.mxu3 %v1358_v32  ;;  %1548 = vmatmul.bf16.vlgmr.msra.gmra.mxu0 %v1358_v32 }
 0x316   :  { %1561 = vmatmul.bf16.vlgmr.msra.gmra.mxu1 %v1358_v32  ;;  %v3056_v32 = vor.u32 %v3458_v18, %v3055_v17 }
 0x318   :  { %1819 = vmatpush.bf16.msrb.mxu0 %v3056_v32  ;;  %v3492_v32 = vld [vmem:[#allocation11 + $0xac] sm:$0xf] }
 0x31c   :  { %1820 = vmatpush.bf16.msrb.mxu0 %v3044_v30 }
 0x320   :  { %1821 = vmatpush.bf16.msrb.mxu0 %v3032_v44 }
 0x392   :  { %v1549_v26 = vpop.f32.mrf.mxu0 }
 0x393   :  { %v1550_v28 = vadd.f32 %v1549_v26, %v1522_v51  ;;  %v3915_v38 = vpop.f32.mrf.mxu1  ;;  %v3035_v51 = vld [vmem:[#allocation11 + $0x30] sm:$0xf]  ;;  %v3040_v26 = vor.u32 %v3453_v24, %v3037_v25  ;;  %v3494_v25 = vld [vmem:[#allocation11 + $0xb8] sm:$0xf0] }
 0x394   :  { %v3036_v29 = vor.u32 %v3454_v6, %v3035_v51  ;;  %v1563_v7 = vadd.f32 %v3915_v38, %v1523_v0  ;;  %v3195_v6 = vld [vmem:[#allocation11 + $0xb4] sm:$0xf0]  ;;  %v3201_v24 = vld [vmem:[#allocation11 + $0xb0] sm:$0xf]  ;;  %v3157_v0 = vld [vmem:[#allocation11 + $0x60] sm:$0xf] }
 0x395   :  { %v1589_v41 = vadd.f32 %v1587_v34, %v1550_v28  ;;  %v3451_v28 = vld [vmem:[#allocation11 + $0x20] sm:$0xf0]  ;;  %v3450_v34 = vld [vmem:[#allocation11 + $0x1c] sm:$0xf]  ;;  %1807 = vmatpush.bf16.msra.mxu3 %v3040_v26  ;;  %v3198_v50 = vor.u32 %v3492_v32, %v3195_v6  ;;  %v3202_v27 = vor.u32 %v3494_v25, %v3201_v24  ;;  %v3135_v32 = vld [vmem:[#allocation11 + $0x3c] sm:$0xf0] }
 0x396   :  { %1794 = vmatpush.bf16.msra.mxu2 %v3036_v29  ;;  %v3024_v42 = vor.u32 %v3451_v28, %v3023_v31  ;;  %v3028_v43 = vor.u32 %v3450_v34, %v3025_v37  ;;  %v3942_v29 = vld [vmem:[#allocation2 + $0x5] ss:$8 sm:$0x7]  ;;  %v3181_v31 = vld [vmem:[#allocation11 + $0x90] sm:$0xf] }
 0x397   :  { %v3008_v52 = vmul.f32 -1.442695, %v1589_v41  ;;  %v3490_v28 = vld [vmem:[#allocation11 + $0x98] sm:$0xf0]  ;;  %v3489_v34 = vld [vmem:[#allocation11 + $0x94] sm:$0xf] }
 0x398   :  { %v1536_v53 = vpop.f32.mrf.mxu3  ;;  %v3183_v37 = vld [vmem:[#allocation11 + $0x9c] sm:$0xf0]  ;;  %v3479_v6 = vld [vmem:[#allocation11 + $0x40] sm:$0xf0] }
 0x399   :  { %v1537_v57 = vadd.f32 %v1536_v53, %v1521_v35  ;;  %3567 = vpow2.f32 %v3008_v52  ;;  %v3013_v52 = vld [vmem:[#allocation11 + $0xc] sm:$0xf0]  ;;  %v3019_v53 = vld [vmem:[#allocation11 + $0x8] sm:$0xf]  ;;  %1808 = vmatpush.bf16.msra.mxu3 %v3028_v43  ;;  %v1849_v43 = vrot.slane %v3942_v29, 1 }
 0x39a   :  { %v1551_v62 = vpop.f32.mrf.mxu0  ;;  %1795 = vmatpush.bf16.msra.mxu2 %v3024_v42  ;;  %v3016_v56 = vor.u32 %v3447_v48, %v3013_v52  ;;  %v3190_v42 = vor.u32 %v3491_v40, %v3189_v39  ;;  %v3487_v48 = vld [vmem:[#allocation11 + $0x80] sm:$0xf0]  ;;  %v3486_v52 = vld [vmem:[#allocation11 + $0x7c] sm:$0xf]  ;;  %v3476_v39 = vld [vmem:[#allocation11 + $0x28] sm:$0xf0] }
 0x39b   :  { %v1566_v4 = vadd.f32 %v1537_v57, %v3911_v23  ;;  %v1564_v5 = vpop.f32.mrf.mxu1  ;;  %v3020_v57 = vor.u32 %v3449_v54, %v3019_v53 }
 0x39d   :  { %v3007_v45 = vmul.f32 -1.442695, %v1566_v4  ;;  %1809 = vmatpush.bf16.msra.mxu3 %v3016_v56  ;;  %1822 = vmatpush.bf16.msrb.mxu0 %v3020_v57  ;;  %v3171_v56 = vld [vmem:[#allocation11 + $0x84] sm:$0xf0]  ;;  %v3177_v57 = vld [vmem:[#allocation11 + $0x80] sm:$0xf] }
 0x39e   :  { %1796 = vmatpush.bf16.msra.mxu2 %v3012_v55  ;;  %v3170_v55 = vor.u32 %v3487_v48, %v3169_v47  ;;  %v3471_v47 = vld [vmem:[#allocation11 + $0x4] sm:$0xf]  ;;  %v3111_v48 = vld [vmem:[#allocation11 + $0xc] sm:$0xf0] }
 0x39f   :  { %3569 = vpow2.f32 %v3007_v45  ;;  %v3568_v14 = vpop.eup %3567 }
 0x3a0   :  { %v1538_v19 = vpop.f32.mrf.mxu3  ;;  %v3919_v9 = vadd.f32 1.0, %v3568_v14 }
 0x3a1   :  { %v3193_v19 = vld [vmem:[#allocation11 + $0xa8] sm:$0xf]  ;;  %2077 = vmatpush.bf16.msrb.mxu3 %v3202_v27  ;;  %v3475_v27 = vld [vmem:[#allocation11 + $0x20] sm:$0xf0] }
 0x3a2   :  { %v1605_v36 = vand.u32 2147483648, %v3919_v9  ;;  %vm1599_vm5 = vweird.f32 %v3919_v9  ;;  %v1603_v33 = vand.u32 2147483647, %v3919_v9  ;;  %v3194_v51 = vor.u32 %v3493_v20, %v3193_v19  ;;  %2064 = vmatpush.bf16.msrb.mxu2 %v3198_v50  ;;  %v3478_v19 = vld [vmem:[#allocation11 + $0x38] sm:$0xf0] }
 0x3a3   :  { %v3477_v20 = vld [vmem:[#allocation11 + $0x34] sm:$0xf]  ;;  %v3121_v50 = vld [vmem:[#allocation11 + $0x18] sm:$0xf] }
 0x3a4   :  { %v1606_v16 = vor.u32 1.1754944e-38, %v1605_v36  ;;  %vm1604_vm7 = vcmp.eq.f32.partialorder %v1603_v33, 8.507059e+37  ;;  %2051 = vmatpush.bf16.msrb.mxu1 %v3194_v51  ;;  %v3147_v36 = vld [vmem:[#allocation11 + $0x54] sm:$0xf0]  ;;  %v3138_v25 = vor.u32 %v3477_v20, %v3135_v32 }
 0x3a5   :  { %v3570_v35 = vpop.eup %3569  ;;  %2078 = vmatpush.bf16.msrb.mxu3 %v3190_v42  ;;  %v3141_v51 = vld [vmem:[#allocation11 + $0x38] sm:$0xf] }
 0x3a6   :  { %v1570_v41 = vadd.f32 1.0, %v3570_v35  ;;  %v3182_v35 = vor.u32 %v3490_v28, %v3181_v31  ;;  %v3474_v31 = vld [vmem:[#allocation11 + $0x1c] sm:$0xf]  ;;  %v3123_v28 = vld [vmem:[#allocation11 + $0x24] sm:$0xf0] }
 0x3a7   :  { %v3126_v42 = vor.u32 %v3474_v31, %v3123_v28  ;;  %v3279_v28 = vld [vmem:[#allocation11 + $0x90] sm:$0xf] }
 0x3a8   :  { %3571 = vrcp.f32 %v1570_v41  ;;  %v1582_v63 = vand.u32 2147483648, %v1570_v41  ;;  %v1580_v2 = vand.u32 2147483647, %v1570_v41  ;;  %vm1576_vm1 = vweird.f32 %v1570_v41  ;;  %2052 = vmatpush.bf16.msrb.mxu1 %v3182_v35 }
 0x3a9   :  { %3573 = vrcp.f32 %v3919_v9 }
 0x3aa   :  { %v1583_v5 = vor.u32 1.1754944e-38, %v1582_v63  ;;  %vm1581_vm3 = vcmp.eq.f32.partialorder %v1580_v2, 8.507059e+37  ;;  %v3483_v2 = vld [vmem:[#allocation11 + $0x64] sm:$0xf] }
 0x3ac   :  { %2053 = vmatpush.bf16.msrb.mxu1 %v3170_v55  ;;  %v3114_v55 = vor.u32 %v3471_v47, %v3111_v48 }
 0x3ae   :  { %v3572_v58 = vpop.eup %3571 }
 0x3af   :  { %v3574_v59 = vpop.eup %3573  ;;  %v1572_v60 = vmul.f32 %v3572_v58, %v1570_v41  ;;  %vm1577_vm0 = vweird.f32 %v3572_v58  ;;  %v3186_v41 = vor.u32 %v3489_v34, %v3183_v37  ;;  %v3129_v37 = vld [vmem:[#allocation11 + $0x20] sm:$0xf] }
 0x3b0   :  { %v1595_v62 = vmul.f32 %v3574_v59, %v3919_v9  ;;  %vm1578_vm2 = vmor %vm1576_vm1, %vm1577_vm0  ;;  %vm1600_vm4 = vweird.f32 %v3574_v59 }
 0x3b1   :  { %v1573_v61 = vsub.f32 1.0, %v1572_v60  ;;  %vm1601_vm6 = vmor %vm1599_vm5, %vm1600_vm4  ;;  %2065 = vmatpush.bf16.msrb.mxu2 %v3186_v41  ;;  %v3122_v41 = vor.u32 %v3475_v27, %v3121_v50 }
 0x3b2   :  { %v1596_v4 = vsub.f32 1.0, %v1595_v62 }
 0x3b3   :  { %v1574_v1 = vmul.f32 %v3572_v58, %v1573_v61 }
 0x3b4   :  { %v1597_v13 = vmul.f32 %v3574_v59, %v1596_v4 }
 0x3b5   :  { %v1575_v3 = vadd.f32 %v3572_v58, %v1574_v1  ;;  %v3484_v1 = vld [vmem:[#allocation11 + $0x68] sm:$0xf0] }
 0x3b6   :  { %v1598_v22 = vadd.f32 %v3574_v59, %v1597_v13 }
 0x3b7   :  { %v1579_v8 = vsel %vm1578_vm2, %v3572_v58, %v1575_v3  ;;  %v3488_v58 = vld [vmem:[#allocation11 + $0x88] sm:$0xf0] }
 0x3b8   :  { %v1584_v10 = vsel %vm1581_vm3, %v1583_v5, %v1579_v8  ;;  %v1602_v45 = vsel %vm1601_vm6, %v3574_v59, %v1598_v22  ;;  %v3174_v59 = vor.u32 %v3486_v52, %v3171_v56  ;;  %v3178_v60 = vor.u32 %v3488_v58, %v3177_v57  ;;  %v3480_v22 = vld [vmem:[#allocation11 + $0x4c] sm:$0xf]  ;;  %v3117_v52 = vld [vmem:[#allocation11 + $0x8] sm:$0xf] }
 0x3b9   :  { %v1609_v12 = vmul.f32 %v1584_v10, %v1563_v7  ;;  %v1607_v23 = vsel %vm1604_vm7, %v1606_v16, %v1602_v45  ;;  %v3158_v5 = vor.u32 %v3484_v1, %v3157_v0  ;;  %v3159_v7 = vld [vmem:[#allocation11 + $0x6c] sm:$0xf0]  ;;  %v3165_v10 = vld [vmem:[#allocation11 + $0x68] sm:$0xf]  ;;  %v3150_v16 = vor.u32 %v3480_v22, %v3147_v36 }
 0x3ba   :  { %2066 = vmatpush.bf16.msrb.mxu2 %v3174_v59  ;;  %2079 = vmatpush.bf16.msrb.mxu3 %v3178_v60  ;;  %v3162_v8 = vor.u32 %v3483_v2, %v3159_v7 }
 0x3bb   :  { %v1612_v15 = vadd.f32 %v1610_v11, %v1609_v12  ;;  %v3485_v11 = vld [vmem:[#allocation11 + $0x70] sm:$0xf0]  ;;  %v3145_v12 = vld [vmem:[#allocation11 + $0x48] sm:$0xf]  ;;  %2054 = vmatpush.bf16.msrb.mxu1 %v3158_v5 }
 0x3bc   :  { %v3166_v13 = vor.u32 %v3485_v11, %v3165_v10  ;;  %v1872_v11 = vrot.slane %v3942_v29, 2 }
 0x3bd   :  { %3575 = vtanh.f32 %v1612_v15  ;;  %v3481_v15 = vld [vmem:[#allocation11 + $0x50] sm:$0xf0] }
 0x3be   :  { %2067 = vmatpush.bf16.msrb.mxu2 %v3162_v8  ;;  %2080 = vmatpush.bf16.msrb.mxu3 %v3166_v13 }
 0x3c2   :  { %2068 = vmatpush.bf16.msrb.mxu2 %v3150_v16 }
 0x3c3   :  { %v3576_v38 = vpop.eup %3575 }
 0x3c4   :  { %v1614_v17 = vsub.f32 %v3901_v21, %v3576_v38  ;;  %v3938_v21 = vld [vmem:[%s4005_s5] sm:$0x7] }
 0x3c5   :  { %v1783_v26 = vperm.slane %v3938_v21, 0  ;;  %v1784_v30 = vperm.slane %v3938_v21, 1 }
 0x3c6   :  { %v1615_v18 = vmul.f32 %v1614_v17, %v1607_v23  ;;  %v3153_v17 = vld [vmem:[#allocation11 + $0x50] sm:$0xf]  ;;  %v3482_v23 = vld [vmem:[#allocation11 + $0x58] sm:$0xf0]  ;;  %2069 = vmatpush.bf16.msrb.mxu2 %v3138_v25 }
 0x3c8   :  { %v3930_v49 = vadd.f32 %v3576_v38, %v1615_v18  ;;  %v3146_v38 = vor.u32 %v3481_v15, %v3145_v12  ;;  %v3133_v18 = vld [vmem:[#allocation11 + $0x30] sm:$0xf] }
 0x3c9   :  { %v3134_v24 = vor.u32 %v3478_v19, %v3133_v18  ;;  %v3516_v19 = vld [vmem:[#allocation11 + $0xac] sm:$0xf] }
 0x3ca   :  { %1617 = vst [vmem:[#allocation12 + $0x4] sm:$0x1] %v3930_v49  ;;  %v1620_v14 = vpack.c.bf16 %v3930_v49, %v3930_v49  ;;  %2055 = vmatpush.bf16.msrb.mxu1 %v3146_v38  ;;  %2070 = vmatpush.bf16.msrb.mxu2 %v3126_v42 }
 0x3cc   :  { %1797 = vmatmul.bf16.vlgmr.msra.gmra.mxu2 %v1620_v14  ;;  %1810 = vmatmul.bf16.vlgmr.msra.gmra.mxu3 %v1620_v14 }
 0x3cd   :  { %1823 = vmatmul.bf16.vlgmr.msrb.gmra.mxu0 %v1620_v14  ;;  %v3154_v14 = vor.u32 %v3482_v23, %v3153_v17  ;;  %v3960_v23 = vld [vmem:[%s4005_s5] sm:$0x7] }
 0x3ce   :  { %2056 = vmatpush.bf16.msrb.mxu1 %v3134_v24  ;;  %2071 = vmatpush.bf16.msrb.mxu2 %v3114_v55  ;;  %v2045_v18 = vperm.slane %v3960_v23, 0  ;;  %v3518_v24 = vld [vmem:[#allocation11 + $0xb8] sm:$0xf0] }
 0x3cf   :  { %2081 = vmatpush.bf16.msrb.mxu3 %v3154_v14  ;;  %v3517_v14 = vld [vmem:[#allocation11 + $0xb0] sm:$0xf0]  ;;  %v3510_v55 = vld [vmem:[#allocation11 + $0x7c] sm:$0xf] }
 0x3d2   :  { %2057 = vmatpush.bf16.msrb.mxu1 %v3122_v41  ;;  %v3515_v41 = vld [vmem:[#allocation11 + $0xa0] sm:$0xf0] }
 0x44a   :  { %v3940_v9 = vpop.f32.mrf.mxu0 }
 0x44f   :  { %v1798_v44 = vpop.f32.mrf.mxu2  ;;  %v1811_v46 = vpop.f32.mrf.mxu3 }
 0x450   :  { %v1799_v53 = vadd.f32 %v1798_v44, %v1783_v26  ;;  %v1812_v54 = vadd.f32 %v1811_v46, %v1784_v30  ;;  %v3142_v30 = vor.u32 %v3479_v6, %v3141_v51  ;;  %v3472_v44 = vld [vmem:[#allocation11 + $0x8] sm:$0xf0]  ;;  %v3130_v46 = vor.u32 %v3476_v39, %v3129_v37  ;;  %v3293_v51 = vld [vmem:[#allocation11 + $0xb4] sm:$0xf0]  ;;  %v3299_v6 = vld [vmem:[#allocation11 + $0xb0] sm:$0xf] }
 0x451   :  { %v3296_v50 = vor.u32 %v3516_v19, %v3293_v51  ;;  %v3300_v27 = vor.u32 %v3518_v24, %v3299_v6  ;;  %v3281_v39 = vld [vmem:[#allocation11 + $0x9c] sm:$0xf0]  ;;  %v3501_v19 = vld [vmem:[#allocation11 + $0x34] sm:$0xf]  ;;  %v3503_v6 = vld [vmem:[#allocation11 + $0x40] sm:$0xf0] }
 0x452   :  { %v1828_v61 = vadd.f32 %v1799_v53, %v3942_v29  ;;  %v1851_v62 = vadd.f32 %v1849_v43, %v1812_v54  ;;  %v1826_v63 = vpop.f32.mrf.mxu0  ;;  %v3109_v43 = vld [vmem:[#allocation11] sm:$0xf]  ;;  %2082 = vmatpush.bf16.msrb.mxu3 %v3142_v30  ;;  %v3473_v53 = vld [vmem:[#allocation11 + $0x10] sm:$0xf0]  ;;  %v2046_v30 = vperm.slane %v3960_v23, 1 }
 0x453   :  { %v3110_v54 = vor.u32 %v3472_v44, %v3109_v43  ;;  %v3118_v56 = vor.u32 %v3473_v53, %v3117_v52  ;;  %v1785_v63 = vperm.slane %v3938_v21, 2  ;;  %2339 = vmatpush.bf16.msra.mxu2 %v3300_v27  ;;  %v3267_v53 = vld [vmem:[#allocation11 + $0x78] sm:$0xf]  ;;  %v3499_v27 = vld [vmem:[#allocation11 + $0x20] sm:$0xf0] }
 0x454   :  { %v3105_v3 = vmul.f32 -1.442695, %v1828_v61  ;;  %v3106_v4 = vmul.f32 -1.442695, %v1851_v62 }
 0x455   :  { %2058 = vmatpush.bf16.msrb.mxu1 %v3110_v54  ;;  %v1825_v5 = vadd.f32 %v3940_v9, %v1785_v63  ;;  %v3511_v54 = vld [vmem:[#allocation11 + $0x80] sm:$0xf0] }
 0x456   :  { %3577 = vpow2.f32 %v3105_v3  ;;  %2083 = vmatpush.bf16.msrb.mxu3 %v3130_v46 }
 0x457   :  { %3579 = vpow2.f32 %v3106_v4  ;;  %v1800_v33 = vpop.f32.mrf.mxu2  ;;  %v1813_v45 = vpop.f32.mrf.mxu3 }
 0x459   :  { %2326 = vmatpush.bf16.msra.mxu1 %v3296_v50  ;;  %v3219_v50 = vld [vmem:[#allocation11 + $0x18] sm:$0xf] }
 0x45a   :  { %2084 = vmatpush.bf16.msrb.mxu3 %v3118_v56 }
 0x45c   :  { %v3578_v26 = vpop.eup %3577 }
 0x45d   :  { %v3580_v34 = vpop.eup %3579  ;;  %v1832_v35 = vadd.f32 1.0, %v3578_v26  ;;  %v3963_v26 = vld [vmem:[#allocation2 + $0x6] ss:$8 sm:$0x7] }
 0x45e   :  { %v1855_v40 = vadd.f32 1.0, %v3580_v34  ;;  %v3514_v34 = vld [vmem:[#allocation11 + $0x98] sm:$0xf0]  ;;  %v2111_v47 = vrot.slane %v3963_v26, 1 }
 0x45f   :  { %3581 = vrcp.f32 %v1832_v35  ;;  %v1844_v61 = vand.u32 2147483648, %v1832_v35  ;;  %v1842_v1 = vand.u32 2147483647, %v1832_v35  ;;  %vm1838_vm9 = vweird.f32 %v1832_v35 }
 0x460   :  { %3583 = vrcp.f32 %v1855_v40  ;;  %v1867_v15 = vand.u32 2147483648, %v1855_v40  ;;  %vm1861_vm13 = vweird.f32 %v1855_v40  ;;  %v1865_v22 = vand.u32 2147483647, %v1855_v40 }
 0x461   :  { %v1845_v3 = vor.u32 1.1754944e-38, %v1844_v61  ;;  %vm1843_vm11 = vcmp.eq.f32.partialorder %v1842_v1, 8.507059e+37  ;;  %v3280_v37 = vor.u32 %v3514_v34, %v3279_v28  ;;  %v3255_v1 = vld [vmem:[#allocation11 + $0x60] sm:$0xf]  ;;  %v3498_v28 = vld [vmem:[#allocation11 + $0x1c] sm:$0xf] }
 0x462   :  { %v1868_v45 = vor.u32 1.1754944e-38, %v1867_v15  ;;  %vm1866_vm15 = vcmp.eq.f32.partialorder %v1865_v22, 8.507059e+37  ;;  %v3221_v34 = vld [vmem:[#allocation11 + $0x24] sm:$0xf0] }
 0x465   :  { %v3582_v57 = vpop.eup %3581 }
 0x466   :  { %v3584_v58 = vpop.eup %3583  ;;  %v1834_v59 = vmul.f32 %v3582_v57, %v1832_v35  ;;  %vm1839_vm8 = vweird.f32 %v3582_v57  ;;  %v3513_v35 = vld [vmem:[#allocation11 + $0x94] sm:$0xf] }
 0x467   :  { %v1857_v62 = vmul.f32 %v3584_v58, %v1855_v40  ;;  %vm1840_vm10 = vmor %vm1838_vm9, %vm1839_vm8  ;;  %vm1862_vm12 = vweird.f32 %v3584_v58  ;;  %v3287_v40 = vld [vmem:[#allocation11 + $0x98] sm:$0xf]  ;;  %v3284_v43 = vor.u32 %v3513_v35, %v3281_v39  ;;  %v3227_v35 = vld [vmem:[#allocation11 + $0x20] sm:$0xf] }
 0x468   :  { %v1835_v60 = vsub.f32 1.0, %v1834_v59  ;;  %vm1863_vm14 = vmor %vm1861_vm13, %vm1862_vm12  ;;  %v3288_v44 = vor.u32 %v3515_v41, %v3287_v40  ;;  %v3275_v59 = vld [vmem:[#allocation11 + $0x80] sm:$0xf]  ;;  %v3220_v40 = vor.u32 %v3499_v27, %v3219_v50 }
 0x469   :  { %v1858_v4 = vsub.f32 1.0, %v1857_v62  ;;  %2327 = vmatpush.bf16.msra.mxu1 %v3284_v43  ;;  %v3207_v43 = vld [vmem:[#allocation11] sm:$0xf] }
 0x46a   :  { %v1836_v0 = vmul.f32 %v3582_v57, %v1835_v60  ;;  %2340 = vmatpush.bf16.msra.mxu2 %v3288_v44  ;;  %v3512_v60 = vld [vmem:[#allocation11 + $0x88] sm:$0xf0] }
 0x46b   :  { %v1859_v12 = vmul.f32 %v3584_v58, %v1858_v4  ;;  %v3276_v63 = vor.u32 %v3512_v60, %v3275_v59  ;;  %v3507_v4 = vld [vmem:[#allocation11 + $0x64] sm:$0xf]  ;;  %v3496_v44 = vld [vmem:[#allocation11 + $0x8] sm:$0xf0] }
 0x46c   :  { %v1837_v2 = vadd.f32 %v3582_v57, %v1836_v0 }
 0x46d   :  { %v1860_v21 = vadd.f32 %v3584_v58, %v1859_v12  ;;  %v3243_v12 = vld [vmem:[#allocation11 + $0x48] sm:$0xf] }
 0x46e   :  { %v1841_v7 = vsel %vm1840_vm10, %v3582_v57, %v1837_v2  ;;  %v3268_v57 = vor.u32 %v3511_v54, %v3267_v53  ;;  %2341 = vmatpush.bf16.msra.mxu2 %v3276_v63  ;;  %v3508_v2 = vld [vmem:[#allocation11 + $0x68] sm:$0xf0]  ;;  %v3215_v54 = vld [vmem:[#allocation11 + $0x8] sm:$0xf] }
 0x46f   :  { %v1846_v8 = vsel %vm1843_vm11, %v1845_v3, %v1841_v7  ;;  %v1864_v36 = vsel %vm1863_vm14, %v3584_v58, %v1860_v21  ;;  %v3269_v58 = vld [vmem:[#allocation11 + $0x84] sm:$0xf0]  ;;  %v3256_v3 = vor.u32 %v3508_v2, %v3255_v1 }
 0x470   :  { %v1871_v10 = vmul.f32 %v1846_v8, %v1825_v5  ;;  %v1869_v38 = vsel %vm1866_vm15, %v1868_v45, %v1864_v36  ;;  %v3272_v62 = vor.u32 %v3510_v55, %v3269_v58  ;;  %v3257_v5 = vld [vmem:[#allocation11 + $0x6c] sm:$0xf0]  ;;  %v3263_v7 = vld [vmem:[#allocation11 + $0x68] sm:$0xf]  ;;  %v3245_v45 = vld [vmem:[#allocation11 + $0x54] sm:$0xf0]  ;;  %v3208_v58 = vor.u32 %v3496_v44, %v3207_v43 }
 0x471   :  { %v3497_v55 = vld [vmem:[#allocation11 + $0x10] sm:$0xf0] }
 0x472   :  { %v1874_v13 = vadd.f32 %v1872_v11, %v1871_v10  ;;  %2328 = vmatpush.bf16.msra.mxu1 %v3272_v62  ;;  %v3260_v10 = vor.u32 %v3507_v4, %v3257_v5  ;;  %v3509_v11 = vld [vmem:[#allocation11 + $0x70] sm:$0xf0]  ;;  %v3216_v63 = vor.u32 %v3497_v55, %v3215_v54 }
 0x473   :  { %v3264_v22 = vor.u32 %v3509_v11, %v3263_v7 }
 0x474   :  { %3585 = vtanh.f32 %v1874_v13  ;;  %v3505_v13 = vld [vmem:[#allocation11 + $0x50] sm:$0xf0] }
 0x475   :  { %v3244_v36 = vor.u32 %v3505_v13, %v3243_v12  ;;  %2342 = vmatpush.bf16.msra.mxu2 %v3264_v22 }
 0x476   :  { %2329 = vmatpush.bf16.msra.mxu1 %v3260_v10 }
 0x47a   :  { %v3586_v33 = vpop.eup %3585 }
 0x47b   :  { %v1876_v9 = vsub.f32 %v3930_v49, %v3586_v33  ;;  %v3291_v49 = vld [vmem:[#allocation11 + $0xa8] sm:$0xf] }
 0x47c   :  { %v3292_v32 = vor.u32 %v3517_v14, %v3291_v49  ;;  %v3502_v49 = vld [vmem:[#allocation11 + $0x38] sm:$0xf0] }
 0x47d   :  { %v1877_v16 = vmul.f32 %v1876_v9, %v1869_v38 }
 0x47e   :  { %2313 = vmatpush.bf16.msra.mxu0 %v3292_v32  ;;  %v3239_v32 = vld [vmem:[#allocation11 + $0x38] sm:$0xf] }
 0x47f   :  { %v3952_v17 = vadd.f32 %v3586_v33, %v1877_v16  ;;  %v3504_v33 = vld [vmem:[#allocation11 + $0x4c] sm:$0xf]  ;;  %v3251_v16 = vld [vmem:[#allocation11 + $0x50] sm:$0xf] }
 0x480   :  { %v3248_v38 = vor.u32 %v3504_v33, %v3245_v45 }
 0x481   :  { %1879 = vst [vmem:[#allocation12 + $0x5] sm:$0x1] %v3952_v17  ;;  %v1882_v29 = vpack.c.bf16 %v3952_v17, %v3952_v17 }
 0x482   :  { %2314 = vmatpush.bf16.msra.mxu0 %v3280_v37  ;;  %2330 = vmatpush.bf16.msra.mxu1 %v3248_v38  ;;  %v3500_v37 = vld [vmem:[#allocation11 + $0x28] sm:$0xf0]  ;;  %v2177_v38 = vld [vmem:[%s4005_s5] sm:$0x7]  ;;  %s3766_s5 = smov [#allocation12]  }
 0x483   :  { %2059 = vmatmul.bf16.vlgmr.msrb.gmra.mxu1 %v1882_v29  ;;  %2072 = vmatmul.bf16.vlgmr.msrb.gmra.mxu2 %v1882_v29  ;;  %v2309_v44 = vperm.slane %v2177_v38, 2  ;;  %s2409_s10 = sshll.u32 %s3766_s5, 4  ;;  %s2410_s10 = int_to_ptr.vmem [resolvable:$true] %s2409_s10 }
 0x484   :  { %2085 = vmatmul.bf16.vlgmr.msrb.gmra.mxu3 %v1882_v29  ;;  %v3506_v29 = vld [vmem:[#allocation11 + $0x58] sm:$0xf0] }
 0x485   :  { %v3252_v14 = vor.u32 %v3506_v29, %v3251_v16  ;;  %v2307_v16 = vperm.slane %v2177_v38, 0  ;;  %v2308_v29 = vperm.slane %v2177_v38, 1 }
 0x486   :  { %2315 = vmatpush.bf16.msra.mxu0 %v3268_v57 }
 0x487   :  { %2343 = vmatpush.bf16.msra.mxu2 %v3252_v14 }
 0x48a   :  { %2316 = vmatpush.bf16.msra.mxu0 %v3256_v3 }
 0x48e   :  { %2317 = vmatpush.bf16.msra.mxu0 %v3244_v36 }
 0x500   :  { %v2060_v20 = vpop.f32.mrf.mxu1 }
 0x501   :  { %v2061_v25 = vadd.f32 %v2060_v20, %v2045_v18  ;;  %v3231_v18 = vld [vmem:[#allocation11 + $0x30] sm:$0xf]  ;;  %v3233_v20 = vld [vmem:[#allocation11 + $0x3c] sm:$0xf0] }
 0x502   :  { %v3232_v51 = vor.u32 %v3502_v49, %v3231_v18 }
 0x503   :  { %v2090_v31 = vadd.f32 %v2061_v25, %v3963_v26  ;;  %v3236_v25 = vor.u32 %v3501_v19, %v3233_v20 }
 0x504   :  { %2318 = vmatpush.bf16.msra.mxu0 %v3232_v51 }
 0x505   :  { %v3203_v42 = vmul.f32 -1.442695, %v2090_v31  ;;  %v3240_v31 = vor.u32 %v3503_v6, %v3239_v32  ;;  %2331 = vmatpush.bf16.msra.mxu1 %v3236_v25 }
 0x506   :  { %v2073_v46 = vpop.f32.mrf.mxu2 }
 0x507   :  { %3587 = vpow2.f32 %v3203_v42  ;;  %v2074_v48 = vadd.f32 %v2073_v46, %v2046_v30  ;;  %v3968_v52 = vpop.f32.mrf.mxu3  ;;  %v3224_v42 = vor.u32 %v3498_v28, %v3221_v34  ;;  %2344 = vmatpush.bf16.msra.mxu2 %v3240_v31  ;;  %v3228_v46 = vor.u32 %v3500_v37, %v3227_v35 }
 0x508   :  { %v2062_v56 = vpop.f32.mrf.mxu1  ;;  %2319 = vmatpush.bf16.msra.mxu0 %v3220_v40 }
 0x509   :  { %v2113_v61 = vadd.f32 %v2111_v47, %v2074_v48  ;;  %v3495_v47 = vld [vmem:[#allocation11 + $0x4] sm:$0xf]  ;;  %v3209_v48 = vld [vmem:[#allocation11 + $0xc] sm:$0xf0]  ;;  %v2047_v56 = vperm.slane %v3960_v23, 2  ;;  %2332 = vmatpush.bf16.msra.mxu1 %v3224_v42 }
 0x50b   :  { %v3204_v0 = vmul.f32 -1.442695, %v2113_v61  ;;  %v3212_v61 = vor.u32 %v3495_v47, %v3209_v48  ;;  %2345 = vmatpush.bf16.msra.mxu2 %v3228_v46  ;;  %v2087_v3 = vadd.f32 %v3968_v52, %v2047_v56 }
 0x50c   :  { %2320 = vmatpush.bf16.msra.mxu0 %v3208_v58 }
 0x50d   :  { %v3588_v8 = vpop.eup %3587  ;;  %3589 = vpow2.f32 %v3204_v0  ;;  %2333 = vmatpush.bf16.msra.mxu1 %v3212_v61 }
 0x50e   :  { %v3970_v21 = vadd.f32 1.0, %v3588_v8  ;;  %v2075_v15 = vpop.f32.mrf.mxu2  ;;  %v2134_v8 = vrot.slane %v3963_v26, 2 }
 0x50f   :  { %v2088_v9 = vpop.f32.mrf.mxu3  ;;  %2346 = vmatpush.bf16.msra.mxu2 %v3216_v63 }
 0x510   :  { %3591 = vrcp.f32 %v3970_v21  ;;  %v2106_v57 = vand.u32 2147483648, %v3970_v21  ;;  %v2104_v60 = vand.u32 2147483647, %v3970_v21  ;;  %vm2100_vm1 = vweird.f32 %v3970_v21 }
 0x512   :  { %v2107_v23 = vor.u32 1.1754944e-38, %v2106_v57  ;;  %vm2105_vm3 = vcmp.eq.f32.partialorder %v2104_v60, 8.507059e+37 }
 0x513   :  { %v3590_v24 = vpop.eup %3589 }
 0x514   :  { %v3973_v30 = vadd.f32 1.0, %v3590_v24 }
 0x516   :  { %v3592_v39 = vpop.eup %3591  ;;  %3593 = vrcp.f32 %v3973_v30  ;;  %v2129_v13 = vand.u32 2147483648, %v3973_v30  ;;  %vm2123_vm5 = vweird.f32 %v3973_v30 }
 0x517   :  { %v2096_v41 = vmul.f32 %v3592_v39, %v3970_v21  ;;  %vm2101_vm0 = vweird.f32 %v3592_v39  ;;  %v2127_v21 = vand.u32 2147483647, %v3973_v30 }
 0x518   :  { %vm2102_vm2 = vmor %vm2100_vm1, %vm2101_vm0  ;;  %v2130_v22 = vor.u32 1.1754944e-38, %v2129_v13 }
 0x519   :  { %v2097_v53 = vsub.f32 1.0, %v2096_v41  ;;  %vm2128_vm7 = vcmp.eq.f32.partialorder %v2127_v21, 8.507059e+37 }
 0x51b   :  { %v2098_v59 = vmul.f32 %v3592_v39, %v2097_v53 }
 0x51c   :  { %v3594_v62 = vpop.eup %3593 }
 0x51d   :  { %v2119_v0 = vmul.f32 %v3594_v62, %v3973_v30  ;;  %v2099_v1 = vadd.f32 %v3592_v39, %v2098_v59  ;;  %vm2124_vm4 = vweird.f32 %v3594_v62 }
 0x51e   :  { %vm2125_vm6 = vmor %vm2123_vm5, %vm2124_vm4 }
 0x51f   :  { %v2120_v2 = vsub.f32 1.0, %v2119_v0  ;;  %v2103_v4 = vsel %vm2102_vm2, %v3592_v39, %v2099_v1 }
 0x520   :  { %v2108_v5 = vsel %vm2105_vm3, %v2107_v23, %v2103_v4 }
 0x521   :  { %v2133_v7 = vmul.f32 %v2108_v5, %v2087_v3  ;;  %v2121_v10 = vmul.f32 %v3594_v62, %v2120_v2 }
 0x523   :  { %v2136_v11 = vadd.f32 %v2134_v8, %v2133_v7  ;;  %v2122_v12 = vadd.f32 %v3594_v62, %v2121_v10 }
 0x525   :  { %3595 = vtanh.f32 %v2136_v11  ;;  %v2126_v52 = vsel %vm2125_vm6, %v3594_v62, %v2122_v12 }
 0x526   :  { %v2131_v33 = vsel %vm2128_vm7, %v2130_v22, %v2126_v52 }
 0x52b   :  { %v3596_v15 = vpop.eup %3595 }
 0x52c   :  { %v2138_v36 = vsub.f32 %v3952_v17, %v3596_v15  ;;  %v2143_v17 = vld [vmem:[#allocation2 + $0x7] ss:$8 sm:$0x7] }
 0x52d   :  { %v2373_v20 = vrot.slane %v2143_v17, 1  ;;  %v2396_v59 = vrot.slane %v2143_v17, 2 }
 0x52e   :  { %v2139_v26 = vmul.f32 %v2138_v36, %v2131_v33 }
 0x530   :  { %v3988_v45 = vadd.f32 %v3596_v15, %v2139_v26 }
 0x532   :  { %2141 = vst [vmem:[#allocation12 + $0x6] sm:$0x1] %v3988_v45  ;;  %v2144_v9 = vpack.c.bf16 %v3988_v45, %v3988_v45 }
 0x534   :  { %2321 = vmatmul.bf16.vlgmr.msra.gmra.mxu0 %v2144_v9  ;;  %2334 = vmatmul.bf16.vlgmr.msra.gmra.mxu1 %v2144_v9 }
 0x535   :  { %2347 = vmatmul.bf16.vlgmr.msra.gmra.mxu2 %v2144_v9 }
 0x5b1   :  { %v2322_v18 = vpop.f32.mrf.mxu0  ;;  %v2335_v49 = vpop.f32.mrf.mxu1 }
 0x5b2   :  { %v2323_v14 = vadd.f32 %v2322_v18, %v2307_v16  ;;  %v2336_v19 = vadd.f32 %v2335_v49, %v2308_v29 }
 0x5b4   :  { %v2352_v32 = vadd.f32 %v2323_v14, %v2143_v17  ;;  %v2375_v51 = vadd.f32 %v2373_v20, %v2336_v19 }
 0x5b6   :  { %v3301_v6 = vmul.f32 -1.442695, %v2352_v32  ;;  %v3302_v24 = vmul.f32 -1.442695, %v2375_v51 }
 0x5b8   :  { %3597 = vpow2.f32 %v3301_v6  ;;  %v2348_v25 = vpop.f32.mrf.mxu2 }
 0x5b9   :  { %3599 = vpow2.f32 %v3302_v24  ;;  %v2324_v50 = vpop.f32.mrf.mxu0  ;;  %v2337_v27 = vpop.f32.mrf.mxu1  ;;  %v2349_v55 = vadd.f32 %v2348_v25, %v2309_v44 }
 0x5be   :  { %v3598_v30 = vpop.eup %3597 }
 0x5bf   :  { %v3600_v31 = vpop.eup %3599  ;;  %v2356_v28 = vadd.f32 1.0, %v3598_v30 }
 0x5c0   :  { %v2379_v34 = vadd.f32 1.0, %v3600_v31  ;;  %v2350_v35 = vpop.f32.mrf.mxu2 }
 0x5c1   :  { %3601 = vrcp.f32 %v2356_v28  ;;  %v2368_v43 = vand.u32 2147483648, %v2356_v28  ;;  %v2366_v47 = vand.u32 2147483647, %v2356_v28  ;;  %vm2362_vm9 = vweird.f32 %v2356_v28 }
 0x5c2   :  { %3603 = vrcp.f32 %v2379_v34  ;;  %v2391_v63 = vand.u32 2147483648, %v2379_v34  ;;  %vm2385_vm13 = vweird.f32 %v2379_v34  ;;  %v2389_v0 = vand.u32 2147483647, %v2379_v34 }
 0x5c3   :  { %v2369_v54 = vor.u32 1.1754944e-38, %v2368_v43  ;;  %vm2367_vm11 = vcmp.eq.f32.partialorder %v2366_v47, 8.507059e+37 }
 0x5c4   :  { %v2392_v2 = vor.u32 1.1754944e-38, %v2391_v63  ;;  %vm2390_vm15 = vcmp.eq.f32.partialorder %v2389_v0, 8.507059e+37 }
 0x5c7   :  { %v3602_v37 = vpop.eup %3601 }
 0x5c8   :  { %v3604_v39 = vpop.eup %3603  ;;  %v2358_v40 = vmul.f32 %v3602_v37, %v2356_v28  ;;  %vm2363_vm8 = vweird.f32 %v3602_v37 }
 0x5c9   :  { %v2381_v42 = vmul.f32 %v3604_v39, %v2379_v34  ;;  %vm2364_vm10 = vmor %vm2362_vm9, %vm2363_vm8  ;;  %vm2386_vm12 = vweird.f32 %v3604_v39 }
 0x5ca   :  { %v2359_v41 = vsub.f32 1.0, %v2358_v40  ;;  %vm2387_vm14 = vmor %vm2385_vm13, %vm2386_vm12 }
 0x5cb   :  { %v2382_v53 = vsub.f32 1.0, %v2381_v42 }
 0x5cc   :  { %v2360_v46 = vmul.f32 %v3602_v37, %v2359_v41 }
 0x5cd   :  { %v2383_v60 = vmul.f32 %v3604_v39, %v2382_v53 }
 0x5ce   :  { %v2361_v48 = vadd.f32 %v3602_v37, %v2360_v46 }
 0x5cf   :  { %v2384_v62 = vadd.f32 %v3604_v39, %v2383_v60 }
 0x5d0   :  { %v2365_v56 = vsel %vm2364_vm10, %v3602_v37, %v2361_v48 }
 0x5d1   :  { %v2370_v57 = vsel %vm2367_vm11, %v2369_v54, %v2365_v56  ;;  %v2388_v1 = vsel %vm2387_vm14, %v3604_v39, %v2384_v62 }
 0x5d2   :  { %v2395_v58 = vmul.f32 %v2370_v57, %v2349_v55  ;;  %v2393_v4 = vsel %vm2390_vm15, %v2392_v2, %v2388_v1 }
 0x5d4   :  { %v2398_v61 = vadd.f32 %v2396_v59, %v2395_v58 }
 0x5d6   :  { %3605 = vtanh.f32 %v2398_v61 }
 0x5dc   :  { %v3606_v23 = vpop.eup %3605 }
 0x5dd   :  { %v2400_v3 = vsub.f32 %v3988_v45, %v3606_v23 }
 0x5df   :  { %v2401_v5 = vmul.f32 %v2400_v3, %v2393_v4 }
 0x5e1   :  { %v2402_v7 = vadd.f32 %v3606_v23, %v2401_v5 }
 0x5e3   :  { %2403 = vst [vmem:[#allocation12 + $0x7] sm:$0x1] %v2402_v7 }
 0x5e4   :  { %2414 = dma.vmem_to_hbm [thread:$0]  %s2410_s10, 128, %s2412_s13, [#allocation5]  }
 0x5e5   :  { %3757 = dma.done.wait [#allocation5], 128  }
 0x5e6   :  { %3758 = vsyncadd [#allocation5], 4294967168 }
 0x5e7   :  { %2419 = vsyncpa [#allocation4], 1 }
 0x5e8   :  { %2420 = vsyncpa [#allocation7], 1 }
 0x5e9   :  { %2421 = vsyncpa [#allocation10], 1 }
 0x5ea   :  { %2422 = vsyncpa [#allocation5], 1 }

</bundles_post_ra>
